<compile_context>
chip_gen: v7x
topology: tpu7x:2x2x1
jax: 0.10.0
libtpu: 0.0.40
codegen_flags: <defaults>
</compile_context>

<pallas_src>
import functools

import jax
import jax.numpy as jnp
from jax import lax
from jax.experimental import pallas as pl
from jax.experimental.pallas import tpu as pltpu


# ----------------------------------------------------------------------------
# Fused kernel
# ----------------------------------------------------------------------------
def _fused_bottleneck_kernel(xh_ref, w1_ref, s1_ref, b1_ref,
                             w2_ref, s2_ref, b2_ref,
                             w3_ref, s3_ref, b3_ref,
                             wsc_ref, ssc_ref, bsc_ref,
                             o_ref, x1p_ref,
                             *, stride, th, kh, H, W, wo, has_shortcut):
    """One (batch, row-tile) step of the fused bottleneck block.

    xh_ref : (1, H+2, W, Cin)  input, zero-padded in H only (whole image block,
                               DMA'd once per batch; rows sliced per tile)
    o_ref  : (1, Cout, th*wo)  output tile, spatial on the lane axis
    x1p_ref: (kh, W+2, T) f32  scratch: zero-padded expanded activation rows
                               needed by this tile (incl. 1-row halo)
    """
    r = pl.program_id(1)
    row0 = r * th                    # first output row of this tile
    in0 = stride * row0              # first (H-padded) input row needed

    cin = w1_ref.shape[0]
    t = w1_ref.shape[1]

    # ---- (1) 1x1 expand + BN + relu6 on the kh rows (incl. halo) ----------
    xin = xh_ref[0, pl.ds(in0, kh), :, :]                          # (kh, W, Cin)
    e = jnp.dot(xin.reshape(kh * W, cin), w1_ref[...],
                preferred_element_type=jnp.float32)                # f32 accum
    e = jnp.clip(e * s1_ref[...] + b1_ref[...], 0.0, 6.0)

    # Assemble the zero-padded x1 tile in VMEM scratch.  W padding = border
    # columns; H padding rows are fixed up conditionally below.  x1 never
    # touches HBM.
    x1p_ref[:, 0:1, :] = jnp.zeros((kh, 1, t), jnp.float32)
    x1p_ref[:, W + 1:W + 2, :] = jnp.zeros((kh, 1, t), jnp.float32)
    x1p_ref[:, 1:W + 1, :] = e.reshape(kh, W, t)

    @pl.when(in0 == 0)                 # tile touches the top image border
    def _():
        x1p_ref[0, :, :] = jnp.zeros((W + 2, t), jnp.float32)

    @pl.when(in0 + kh == H + 2)        # tile touches the bottom image border
    def _():
        x1p_ref[kh - 1, :, :] = jnp.zeros((W + 2, t), jnp.float32)

    # ---- (2) 3x3 depthwise conv + BN + relu6 (f32, channels on lanes) -----
    x1p = x1p_ref[...]                 # load once; no per-tap reload / cast
    acc = jnp.zeros((th, wo, t), jnp.float32)
    for di in range(3):
        for dj in range(3):
            tap = lax.slice(
                x1p, (di, dj, 0),
                (di + stride * (th - 1) + 1, dj + stride * (wo - 1) + 1, t),
                (stride, stride, 1))
            acc = acc + tap * w2_ref[di * 3 + dj]
    x2 = jnp.clip(acc * s2_ref[...] + b2_ref[...], 0.0, 6.0)       # (th, wo, T)

    # ---- (3) 1x1 project + BN (+ fused 1x1 shortcut + BN) -----------------
    x2m = x2.reshape(th * wo, t).astype(w3_ref.dtype)
    out = jnp.dot(x2m, w3_ref[...], preferred_element_type=jnp.float32)
    out = out * s3_ref[...] + b3_ref[...]                          # (th*wo, Cout)

    if has_shortcut:
        # stride == 1 here, so wo == W and output rows == input rows.
        xsc = xh_ref[0, pl.ds(row0 + 1, th), :, :]                 # skip top pad
        sc = jnp.dot(xsc.reshape(th * W, cin), wsc_ref[...],
                     preferred_element_type=jnp.float32)
        out = out + (sc * ssc_ref[...] + bsc_ref[...])

    # Spatial on the 128-lane axis -> dense stores; result is already NC(H*W).
    o_ref[0] = out.T.astype(o_ref.dtype)


# ----------------------------------------------------------------------------
# Tile selection + wrapper
# ----------------------------------------------------------------------------
def _divisors(n):
    return [d for d in range(1, n + 1) if n % d == 0]


def _pick_row_tile(Ho, Wo, W, T, Cout, stride, budget_bytes=8 * 1024 * 1024):
    """Largest output-row tile whose per-step VMEM footprint fits the budget
    and whose output block keeps the lane axis a multiple of 128 (or full)."""
    cands = [d for d in _divisors(Ho) if d == Ho or (d * Wo) % 128 == 0]
    for th in sorted(cands, reverse=True):
        kh = stride * (th - 1) + 3
        est = 4 * (kh * (W + 2) * T          # x1p scratch
                   + kh * W * T              # expand intermediate
                   + 2 * th * Wo * T         # depthwise acc + x2
                   + 2 * th * Wo * Cout)     # double-buffered output block
        if est <= budget_bytes:
            return th
    return min(cands)


def _bn_fold(gamma, beta, mean, var, eps=1e-5):
    scale = gamma * lax.rsqrt(var + eps)
    shift = beta - mean * scale
    return scale.astype(jnp.float32), shift.astype(jnp.float32)


def bottleneck_forward(x_nchw, params, stride, *,
                       compute_dtype=jnp.bfloat16, row_tile=None):
    """Fused Pallas forward pass; input/output NCHW like the PyTorch module.

    compute_dtype: dtype of the 1x1-conv MXU operands.  bf16 halves activation
    traffic and matches the native MXU dtype on v5e/v6e/v7x; accumulation, BN
    scale/shift and the depthwise elementwise math stay in f32 (v5e-safe).
    """
    N, Cin, H, W = x_nchw.shape
    T = params["w1"].shape[1]
    Cout = params["w3"].shape[1]
    Ho = (H + 2 - 3) // stride + 1
    Wo = (W + 2 - 3) // stride + 1

    th = row_tile if row_tile is not None else _pick_row_tile(
        Ho, Wo, W, T, Cout, stride)
    if Ho % th != 0:
        raise ValueError(f"row_tile={th} must divide Ho={Ho}")
    if th != Ho and (th * Wo) % 128 != 0:
        raise ValueError("row_tile*Wo must be a multiple of 128 (or th == Ho)")
    R = Ho // th
    kh = stride * (th - 1) + 3

    # NCHW -> NHWC, zero-pad H only (W padding is built inside the kernel on
    # the in-VMEM expanded activation).  This touches only the small input.
    xh = jnp.pad(jnp.transpose(x_nchw, (0, 2, 3, 1)).astype(compute_dtype),
                 ((0, 0), (1, 1), (0, 0), (0, 0)))
    Hp = H + 2

    s1, b1 = _bn_fold(*params["bn1"])
    s2, b2 = _bn_fold(*params["bn2"])
    s3, b3 = _bn_fold(*params["bn3"])
    ssc, bsc = _bn_fold(*params["bnsc"])

    w1 = params["w1"].astype(compute_dtype)
    w2 = params["w2"].reshape(9, T).astype(jnp.float32)
    w3 = params["w3"].astype(compute_dtype)
    wsc = params["wsc"].astype(compute_dtype)

    cbytes = jnp.dtype(compute_dtype).itemsize
    vmem_est = (2 * Hp * W * Cin * cbytes              # double-buffered input
                + 2 * Cout * th * Wo * 4               # double-buffered output
                + kh * (W + 2) * T * 4                 # x1p scratch
                + (kh * W * T + 2 * th * Wo * T) * 4   # in-kernel intermediates
                + (Cin * T + T * Cout + Cin * Cout) * cbytes
                + (9 * T + 4 * T + 4 * Cout) * 4)
    # Explicit scoped-VMEM request; stays well below v7x's 64 MiB physical.
    vmem_limit = int(min(max(2 * vmem_est, 32 * 1024 * 1024), 48 * 1024 * 1024))

    kernel = functools.partial(
        _fused_bottleneck_kernel, stride=stride, th=th, kh=kh, H=H, W=W,
        wo=Wo, has_shortcut=(stride == 1))

    wfull = lambda n, r: (0, 0)        # weights / BN params stay VMEM-resident

    # TODO(synk): for very large T/Cout (>~1024) add a 128-lane channel-tiling
    #             grid axis; not needed for MobileNetV2-sized channels.
    out3 = pl.pallas_call(
        kernel,
        out_shape=jax.ShapeDtypeStruct((N, Cout, Ho * Wo), jnp.float32),
        grid=(N, R),
        in_specs=[
            pl.BlockSpec((1, Hp, W, Cin), lambda n, r: (n, 0, 0, 0)),
            pl.BlockSpec((Cin, T), wfull),
            pl.BlockSpec((1, T), wfull), pl.BlockSpec((1, T), wfull),
            pl.BlockSpec((9, T), wfull),
            pl.BlockSpec((1, T), wfull), pl.BlockSpec((1, T), wfull),
            pl.BlockSpec((T, Cout), wfull),
            pl.BlockSpec((1, Cout), wfull), pl.BlockSpec((1, Cout), wfull),
            pl.BlockSpec((Cin, Cout), wfull),
            pl.BlockSpec((1, Cout), wfull), pl.BlockSpec((1, Cout), wfull),
        ],
        out_specs=pl.BlockSpec((1, Cout, th * Wo), lambda n, r: (n, 0, r)),
        scratch_shapes=[pltpu.VMEM((kh, W + 2, T), jnp.float32)],
        compiler_params=pltpu.CompilerParams(
            dimension_semantics=("parallel", "parallel"),
            vmem_limit_bytes=vmem_limit),
    )(xh, w1, s1.reshape(1, -1), b1.reshape(1, -1),
      w2, s2.reshape(1, -1), b2.reshape(1, -1),
      w3, s3.reshape(1, -1), b3.reshape(1, -1),
      wsc, ssc.reshape(1, -1), bsc.reshape(1, -1))

    return out3.reshape(N, Cout, Ho, Wo)   # already NCHW; reshape is free


# ----------------------------------------------------------------------------
# Parameter construction
# ----------------------------------------------------------------------------
def init_bottleneck_params(key, in_chn, out_chn, expansion):
    t_chn = expansion * in_chn
    ks = jax.random.split(key, 8)

    def bn_params(k, c):
        k1, k2, k3, k4 = jax.random.split(k, 4)
        gamma = 1.0 + 0.1 * jax.random.normal(k1, (c,), jnp.float32)
        beta = 0.1 * jax.random.normal(k2, (c,), jnp.float32)
        mean = 0.1 * jax.random.normal(k3, (c,), jnp.float32)
        var = 1.0 + 0.1 * jax.random.uniform(k4, (c,), jnp.float32)
        return gamma, beta, mean, var

    return {
        "w1": 0.1 * jax.random.normal(ks[0], (in_chn, t_chn), jnp.float32),
        "w2": 0.1 * jax.random.normal(ks[1], (3, 3, t_chn), jnp.float32),
        "w3": 0.1 * jax.random.normal(ks[2], (t_chn, out_chn), jnp.float32),
        "wsc": 0.1 * jax.random.normal(ks[3], (in_chn, out_chn), jnp.float32),
        "bn1": bn_params(ks[4], t_chn),
        "bn2": bn_params(ks[5], t_chn),
        "bn3": bn_params(ks[6], out_chn),
        "bnsc": bn_params(ks[7], out_chn),
    }


# ----------------------------------------------------------------------------
# Pure-JAX reference (NHWC convs via lax) for correctness check
# ----------------------------------------------------------------------------
def bottleneck_reference(x_nchw, params, stride, eps=1e-5):
    x = jnp.transpose(x_nchw, (0, 2, 3, 1)).astype(jnp.float32)
    Cin = x.shape[-1]
    T = params["w1"].shape[1]
    Cout = params["w3"].shape[1]
    dn = ("NHWC", "HWIO", "NHWC")

    def bn(y, p):
        g, b, m, v = p
        return (y - m) * (g / jnp.sqrt(v + eps)) + b

    y = lax.conv_general_dilated(x, params["w1"].reshape(1, 1, Cin, T),
                                 (1, 1), "VALID", dimension_numbers=dn)
    y = jnp.clip(bn(y, params["bn1"]), 0.0, 6.0)
    y = lax.conv_general_dilated(y, params["w2"].reshape(3, 3, 1, T),
                                 (stride, stride), ((1, 1), (1, 1)),
                                 dimension_numbers=dn, feature_group_count=T)
    y = jnp.clip(bn(y, params["bn2"]), 0.0, 6.0)
    y = lax.conv_general_dilated(y, params["w3"].reshape(1, 1, T, Cout),
                                 (1, 1), "VALID", dimension_numbers=dn)
    y = bn(y, params["bn3"])
    if stride == 1:
        sc = lax.conv_general_dilated(x, params["wsc"].reshape(1, 1, Cin, Cout),
                                      (1, 1), "VALID", dimension_numbers=dn)
        y = y + bn(sc, params["bnsc"])
    return jnp.transpose(y, (0, 3, 1, 2))


# ----------------------------------------------------------------------------
if __name__ == "__main__":
    key = jax.random.PRNGKey(0)
    k_x1, k_x2, k_p1, k_p2 = jax.random.split(key, 4)

    N, Cin, out_chn, expansion = 2, 4, 8, 2

    # Case A: stride=1, forced two row-tiles per image (exercises the halo), f32.
    H = W = 16
    xA = jax.random.normal(k_x1, (N, Cin, H, W), jnp.float32)
    pA = init_bottleneck_params(k_p1, Cin, out_chn, expansion)
    outA = jax.block_until_ready(
        bottleneck_forward(xA, pA, stride=1, compute_dtype=jnp.float32,
                           row_tile=8))
    refA = jax.block_until_ready(bottleneck_reference(xA, pA, 1))
    assert outA.shape == (N, out_chn, H, W), outA.shape
    errA = float(jnp.max(jnp.abs(outA - refA)))
    assert errA < 1e-3, f"stride-1 f32 mismatch: {errA}"

    # Case B: stride=2, two row-tiles (strided halo), f32.
    H2 = W2 = 32
    xB = jax.random.normal(k_x2, (N, Cin, H2, W2), jnp.float32)
    pB = init_bottleneck_params(k_p2, Cin, out_chn, expansion)
    outB = jax.block_until_ready(
        bottleneck_forward(xB, pB, stride=2, compute_dtype=jnp.float32,
                           row_tile=8))
    refB = jax.block_until_ready(bottleneck_reference(xB, pB, 2))
    assert outB.shape == (N, out_chn, H2 // 2, W2 // 2), outB.shape
    errB = float(jnp.max(jnp.abs(outB - refB)))
    assert errB < 1e-3, f"stride-2 f32 mismatch: {errB}"

    # Case C: default config (auto row tile, bf16 MXU operands, f32 accumulate).
    outC = jax.block_until_ready(bottleneck_forward(xA, pA, stride=1))
    assert outC.shape == refA.shape, outC.shape
    errC = float(jnp.max(jnp.abs(outC - refA)))
    assert errC < 5e-2, f"bf16 mismatch too large: {errC}"

    print("KERNEL_OK")
</pallas_src>

<mosaic_0001>
module attributes {stable_mosaic.version = 11 : i64} {
  func.func @_fused_bottleneck_kernel(%arg0: i32, %arg1: i32, %arg2: memref<1x18x16x4xf32, #tpu.memory_space<vmem>>, %arg3: memref<4x8xf32, #tpu.memory_space<vmem>>, %arg4: memref<1x8xf32, #tpu.memory_space<vmem>>, %arg5: memref<1x8xf32, #tpu.memory_space<vmem>>, %arg6: memref<9x8xf32, #tpu.memory_space<vmem>>, %arg7: memref<1x8xf32, #tpu.memory_space<vmem>>, %arg8: memref<1x8xf32, #tpu.memory_space<vmem>>, %arg9: memref<8x8xf32, #tpu.memory_space<vmem>>, %arg10: memref<1x8xf32, #tpu.memory_space<vmem>>, %arg11: memref<1x8xf32, #tpu.memory_space<vmem>>, %arg12: memref<4x8xf32, #tpu.memory_space<vmem>>, %arg13: memref<1x8xf32, #tpu.memory_space<vmem>>, %arg14: memref<1x8xf32, #tpu.memory_space<vmem>>, %arg15: memref<1x8x128xf32, #tpu.memory_space<vmem>>, %arg16: memref<10x18x8xf32, #tpu.memory_space<vmem>>) attributes {dimension_semantics = [#tpu.dimension_semantics<parallel>, #tpu.dimension_semantics<parallel>], iteration_bounds = array<i64: 2, 2>, scalar_prefetch = 0 : i64, scratch_operands = 1 : i64, tpu.core_type = #tpu.core_type<tc>, window_params = [{transform_indices = @transform_0, window_bounds = array<i64: 1, 18, 16, 4>}, {pipeline_mode = #tpu.pipeline_mode<synchronous>, transform_indices = @transform_1, window_bounds = array<i64: 4, 8>}, {pipeline_mode = #tpu.pipeline_mode<synchronous>, transform_indices = @transform_2, window_bounds = array<i64: 1, 8>}, {pipeline_mode = #tpu.pipeline_mode<synchronous>, transform_indices = @transform_3, window_bounds = array<i64: 1, 8>}, {pipeline_mode = #tpu.pipeline_mode<synchronous>, transform_indices = @transform_4, window_bounds = array<i64: 9, 8>}, {pipeline_mode = #tpu.pipeline_mode<synchronous>, transform_indices = @transform_5, window_bounds = array<i64: 1, 8>}, {pipeline_mode = #tpu.pipeline_mode<synchronous>, transform_indices = @transform_6, window_bounds = array<i64: 1, 8>}, {pipeline_mode = #tpu.pipeline_mode<synchronous>, transform_indices = @transform_7, window_bounds = array<i64: 8, 8>}, {pipeline_mode = #tpu.pipeline_mode<synchronous>, transform_indices = @transform_8, window_bounds = array<i64: 1, 8>}, {pipeline_mode = #tpu.pipeline_mode<synchronous>, transform_indices = @transform_9, window_bounds = array<i64: 1, 8>}, {pipeline_mode = #tpu.pipeline_mode<synchronous>, transform_indices = @transform_10, window_bounds = array<i64: 4, 8>}, {pipeline_mode = #tpu.pipeline_mode<synchronous>, transform_indices = @transform_11, window_bounds = array<i64: 1, 8>}, {pipeline_mode = #tpu.pipeline_mode<synchronous>, transform_indices = @transform_12, window_bounds = array<i64: 1, 8>}, {transform_indices = @transform_13, window_bounds = array<i64: 1, 8, 128>}]} {
    %c8_i32 = arith.constant 8 : i32
    %0 = arith.muli %arg1, %c8_i32 : i32
    %c1_i32 = arith.constant 1 : i32
    %1 = arith.muli %c1_i32, %0 : i32
    %c0 = arith.constant 0 : index
    %2 = arith.index_cast %1 : i32 to index
    %c0_0 = arith.constant 0 : index
    %c0_1 = arith.constant 0 : index
    %3 = vector.load %arg2[%c0, %2, %c0_0, %c0_1] : memref<1x18x16x4xf32, #tpu.memory_space<vmem>>, vector<1x10x16x4xf32>
    %4 = vector.shape_cast %3 : vector<1x10x16x4xf32> to vector<10x16x4xf32>
    %5 = vector.shape_cast %4 : vector<10x16x4xf32> to vector<160x4xf32>
    %c0_2 = arith.constant 0 : index
    %c0_3 = arith.constant 0 : index
    %6 = vector.load %arg3[%c0_2, %c0_3] : memref<4x8xf32, #tpu.memory_space<vmem>>, vector<4x8xf32>
    %cst = arith.constant dense<0.000000e+00> : vector<160x8xf32>
    %7 = tpu.matmul %5, %6, %cst {dimension_numbers = #tpu.dot_dimension_numbers<[1], [0], [0], [1], [0, 0, 1, 1], [], []>} : vector<160x4xf32>, vector<4x8xf32>, vector<160x8xf32> -> vector<160x8xf32>
    %c0_4 = arith.constant 0 : index
    %c0_5 = arith.constant 0 : index
    %8 = vector.load %arg4[%c0_4, %c0_5] : memref<1x8xf32, #tpu.memory_space<vmem>>, vector<1x8xf32>
    %9 = vector.broadcast %8 : vector<1x8xf32> to vector<160x8xf32>
    %10 = arith.mulf %7, %9 : vector<160x8xf32>
    %c0_6 = arith.constant 0 : index
    %c0_7 = arith.constant 0 : index
    %11 = vector.load %arg5[%c0_6, %c0_7] : memref<1x8xf32, #tpu.memory_space<vmem>>, vector<1x8xf32>
    %12 = vector.broadcast %11 : vector<1x8xf32> to vector<160x8xf32>
    %13 = arith.addf %10, %12 : vector<160x8xf32>
    %cst_8 = arith.constant 0.000000e+00 : f32
    %cst_9 = arith.constant 6.000000e+00 : f32
    %14 = vector.broadcast %cst_8 : f32 to vector<160x8xf32>
    %15 = arith.maximumf %14, %13 : vector<160x8xf32>
    %16 = vector.broadcast %cst_9 : f32 to vector<160x8xf32>
    %17 = arith.minimumf %16, %15 : vector<160x8xf32>
    %cst_10 = arith.constant 0.000000e+00 : f32
    %18 = vector.broadcast %cst_10 : f32 to vector<10x1x8xf32>
    %c0_11 = arith.constant 0 : index
    %c0_12 = arith.constant 0 : index
    %c0_13 = arith.constant 0 : index
    %19 = vector.load %arg16[%c0_11, %c0_12, %c0_13] : memref<10x18x8xf32, #tpu.memory_space<vmem>>, vector<10x1x8xf32>
    tpu.vector_store %arg16[%c0_11, %c0_12, %c0_13], %18 {strides = array<i32>} : memref<10x18x8xf32, #tpu.memory_space<vmem>>, vector<10x1x8xf32>,
    %cst_14 = arith.constant 0.000000e+00 : f32
    %20 = vector.broadcast %cst_14 : f32 to vector<10x1x8xf32>
    %c0_15 = arith.constant 0 : index
    %c17 = arith.constant 17 : index
    %c0_16 = arith.constant 0 : index
    %21 = vector.load %arg16[%c0_15, %c17, %c0_16] : memref<10x18x8xf32, #tpu.memory_space<vmem>>, vector<10x1x8xf32>
    tpu.vector_store %arg16[%c0_15, %c17, %c0_16], %20 {strides = array<i32>} : memref<10x18x8xf32, #tpu.memory_space<vmem>>, vector<10x1x8xf32>,
    %22 = vector.shape_cast %17 : vector<160x8xf32> to vector<10x16x8xf32>
    %c0_17 = arith.constant 0 : index
    %c1 = arith.constant 1 : index
    %c0_18 = arith.constant 0 : index
    %23 = vector.load %arg16[%c0_17, %c1, %c0_18] : memref<10x18x8xf32, #tpu.memory_space<vmem>>, vector<10x16x8xf32>
    tpu.vector_store %arg16[%c0_17, %c1, %c0_18], %22 {strides = array<i32>} : memref<10x18x8xf32, #tpu.memory_space<vmem>>, vector<10x16x8xf32>,
    %c0_i32 = arith.constant 0 : i32
    %24 = arith.cmpi eq, %1, %c0_i32 : i32
    %25 = arith.extui %24 : i1 to i32
    %c0_i32_19 = arith.constant 0 : i32
    %26 = arith.cmpi ne, %25, %c0_i32_19 : i32
    scf.if %26 {
      %cst_63 = arith.constant 0.000000e+00 : f32
      %135 = vector.broadcast %cst_63 : f32 to vector<18x8xf32>
      %c0_64 = arith.constant 0 : index
      %c0_65 = arith.constant 0 : index
      %c0_66 = arith.constant 0 : index
      %136 = vector.load %arg16[%c0_64, %c0_65, %c0_66] : memref<10x18x8xf32, #tpu.memory_space<vmem>>, vector<1x18x8xf32>
      %137 = vector.shape_cast %136 : vector<1x18x8xf32> to vector<18x8xf32>
      %138 = vector.shape_cast %135 : vector<18x8xf32> to vector<1x18x8xf32>
      tpu.vector_store %arg16[%c0_64, %c0_65, %c0_66], %138 {strides = array<i32>} : memref<10x18x8xf32, #tpu.memory_space<vmem>>, vector<1x18x8xf32>,
    } else {
    }
    %c10_i32 = arith.constant 10 : i32
    %27 = arith.addi %1, %c10_i32 : i32
    %c18_i32 = arith.constant 18 : i32
    %28 = arith.cmpi eq, %27, %c18_i32 : i32
    %29 = arith.extui %28 : i1 to i32
    %c0_i32_20 = arith.constant 0 : i32
    %30 = arith.cmpi ne, %29, %c0_i32_20 : i32
    scf.if %30 {
      %cst_63 = arith.constant 0.000000e+00 : f32
      %135 = vector.broadcast %cst_63 : f32 to vector<18x8xf32>
      %c9 = arith.constant 9 : index
      %c0_64 = arith.constant 0 : index
      %c0_65 = arith.constant 0 : index
      %136 = vector.load %arg16[%c9, %c0_64, %c0_65] : memref<10x18x8xf32, #tpu.memory_space<vmem>>, vector<1x18x8xf32>
      %137 = vector.shape_cast %136 : vector<1x18x8xf32> to vector<18x8xf32>
      %138 = vector.shape_cast %135 : vector<18x8xf32> to vector<1x18x8xf32>
      tpu.vector_store %arg16[%c9, %c0_64, %c0_65], %138 {strides = array<i32>} : memref<10x18x8xf32, #tpu.memory_space<vmem>>, vector<1x18x8xf32>,
    } else {
    }
    %c0_21 = arith.constant 0 : index
    %c0_22 = arith.constant 0 : index
    %c0_23 = arith.constant 0 : index
    %31 = vector.load %arg16[%c0_21, %c0_22, %c0_23] : memref<10x18x8xf32, #tpu.memory_space<vmem>>, vector<10x18x8xf32>
    %cst_24 = arith.constant 0.000000e+00 : f32
    %32 = vector.broadcast %cst_24 : f32 to vector<8x16x8xf32>
    %33 = vector.extract_strided_slice %31 {offsets = [0, 0, 0], sizes = [8, 16, 8], strides = [1, 1, 1]} : vector<10x18x8xf32> to vector<8x16x8xf32>
    %c0_25 = arith.constant 0 : index
    %c0_26 = arith.constant 0 : index
    %34 = vector.load %arg6[%c0_25, %c0_26] : memref<9x8xf32, #tpu.memory_space<vmem>>, vector<1x8xf32>
    %35 = vector.shape_cast %34 : vector<1x8xf32> to vector<8xf32>
    %36 = vector.shape_cast %35 : vector<8xf32> to vector<1x1x8xf32>
    %37 = vector.broadcast %36 : vector<1x1x8xf32> to vector<8x16x8xf32>
    %38 = arith.mulf %33, %37 : vector<8x16x8xf32>
    %39 = arith.addf %32, %38 : vector<8x16x8xf32>
    %40 = vector.extract_strided_slice %31 {offsets = [0, 1, 0], sizes = [8, 16, 8], strides = [1, 1, 1]} : vector<10x18x8xf32> to vector<8x16x8xf32>
    %c1_27 = arith.constant 1 : index
    %c0_28 = arith.constant 0 : index
    %41 = vector.load %arg6[%c1_27, %c0_28] : memref<9x8xf32, #tpu.memory_space<vmem>>, vector<1x8xf32>
    %42 = vector.shape_cast %41 : vector<1x8xf32> to vector<8xf32>
    %43 = vector.shape_cast %42 : vector<8xf32> to vector<1x1x8xf32>
    %44 = vector.broadcast %43 : vector<1x1x8xf32> to vector<8x16x8xf32>
    %45 = arith.mulf %40, %44 : vector<8x16x8xf32>
    %46 = arith.addf %39, %45 : vector<8x16x8xf32>
    %47 = vector.extract_strided_slice %31 {offsets = [0, 2, 0], sizes = [8, 16, 8], strides = [1, 1, 1]} : vector<10x18x8xf32> to vector<8x16x8xf32>
    %c2 = arith.constant 2 : index
    %c0_29 = arith.constant 0 : index
    %48 = vector.load %arg6[%c2, %c0_29] : memref<9x8xf32, #tpu.memory_space<vmem>>, vector<1x8xf32>
    %49 = vector.shape_cast %48 : vector<1x8xf32> to vector<8xf32>
    %50 = vector.shape_cast %49 : vector<8xf32> to vector<1x1x8xf32>
    %51 = vector.broadcast %50 : vector<1x1x8xf32> to vector<8x16x8xf32>
    %52 = arith.mulf %47, %51 : vector<8x16x8xf32>
    %53 = arith.addf %46, %52 : vector<8x16x8xf32>
    %54 = vector.extract_strided_slice %31 {offsets = [1, 0, 0], sizes = [8, 16, 8], strides = [1, 1, 1]} : vector<10x18x8xf32> to vector<8x16x8xf32>
    %c3 = arith.constant 3 : index
    %c0_30 = arith.constant 0 : index
    %55 = vector.load %arg6[%c3, %c0_30] : memref<9x8xf32, #tpu.memory_space<vmem>>, vector<1x8xf32>
    %56 = vector.shape_cast %55 : vector<1x8xf32> to vector<8xf32>
    %57 = vector.shape_cast %56 : vector<8xf32> to vector<1x1x8xf32>
    %58 = vector.broadcast %57 : vector<1x1x8xf32> to vector<8x16x8xf32>
    %59 = arith.mulf %54, %58 : vector<8x16x8xf32>
    %60 = arith.addf %53, %59 : vector<8x16x8xf32>
    %61 = vector.extract_strided_slice %31 {offsets = [1, 1, 0], sizes = [8, 16, 8], strides = [1, 1, 1]} : vector<10x18x8xf32> to vector<8x16x8xf32>
    %c4 = arith.constant 4 : index
    %c0_31 = arith.constant 0 : index
    %62 = vector.load %arg6[%c4, %c0_31] : memref<9x8xf32, #tpu.memory_space<vmem>>, vector<1x8xf32>
    %63 = vector.shape_cast %62 : vector<1x8xf32> to vector<8xf32>
    %64 = vector.shape_cast %63 : vector<8xf32> to vector<1x1x8xf32>
    %65 = vector.broadcast %64 : vector<1x1x8xf32> to vector<8x16x8xf32>
    %66 = arith.mulf %61, %65 : vector<8x16x8xf32>
    %67 = arith.addf %60, %66 : vector<8x16x8xf32>
    %68 = vector.extract_strided_slice %31 {offsets = [1, 2, 0], sizes = [8, 16, 8], strides = [1, 1, 1]} : vector<10x18x8xf32> to vector<8x16x8xf32>
    %c5 = arith.constant 5 : index
    %c0_32 = arith.constant 0 : index
    %69 = vector.load %arg6[%c5, %c0_32] : memref<9x8xf32, #tpu.memory_space<vmem>>, vector<1x8xf32>
    %70 = vector.shape_cast %69 : vector<1x8xf32> to vector<8xf32>
    %71 = vector.shape_cast %70 : vector<8xf32> to vector<1x1x8xf32>
    %72 = vector.broadcast %71 : vector<1x1x8xf32> to vector<8x16x8xf32>
    %73 = arith.mulf %68, %72 : vector<8x16x8xf32>
    %74 = arith.addf %67, %73 : vector<8x16x8xf32>
    %75 = vector.extract_strided_slice %31 {offsets = [2, 0, 0], sizes = [8, 16, 8], strides = [1, 1, 1]} : vector<10x18x8xf32> to vector<8x16x8xf32>
    %c6 = arith.constant 6 : index
    %c0_33 = arith.constant 0 : index
    %76 = vector.load %arg6[%c6, %c0_33] : memref<9x8xf32, #tpu.memory_space<vmem>>, vector<1x8xf32>
    %77 = vector.shape_cast %76 : vector<1x8xf32> to vector<8xf32>
    %78 = vector.shape_cast %77 : vector<8xf32> to vector<1x1x8xf32>
    %79 = vector.broadcast %78 : vector<1x1x8xf32> to vector<8x16x8xf32>
    %80 = arith.mulf %75, %79 : vector<8x16x8xf32>
    %81 = arith.addf %74, %80 : vector<8x16x8xf32>
    %82 = vector.extract_strided_slice %31 {offsets = [2, 1, 0], sizes = [8, 16, 8], strides = [1, 1, 1]} : vector<10x18x8xf32> to vector<8x16x8xf32>
    %c7 = arith.constant 7 : index
    %c0_34 = arith.constant 0 : index
    %83 = vector.load %arg6[%c7, %c0_34] : memref<9x8xf32, #tpu.memory_space<vmem>>, vector<1x8xf32>
    %84 = vector.shape_cast %83 : vector<1x8xf32> to vector<8xf32>
    %85 = vector.shape_cast %84 : vector<8xf32> to vector<1x1x8xf32>
    %86 = vector.broadcast %85 : vector<1x1x8xf32> to vector<8x16x8xf32>
    %87 = arith.mulf %82, %86 : vector<8x16x8xf32>
    %88 = arith.addf %81, %87 : vector<8x16x8xf32>
    %89 = vector.extract_strided_slice %31 {offsets = [2, 2, 0], sizes = [8, 16, 8], strides = [1, 1, 1]} : vector<10x18x8xf32> to vector<8x16x8xf32>
    %c8 = arith.constant 8 : index
    %c0_35 = arith.constant 0 : index
    %90 = vector.load %arg6[%c8, %c0_35] : memref<9x8xf32, #tpu.memory_space<vmem>>, vector<1x8xf32>
    %91 = vector.shape_cast %90 : vector<1x8xf32> to vector<8xf32>
    %92 = vector.shape_cast %91 : vector<8xf32> to vector<1x1x8xf32>
    %93 = vector.broadcast %92 : vector<1x1x8xf32> to vector<8x16x8xf32>
    %94 = arith.mulf %89, %93 : vector<8x16x8xf32>
    %95 = arith.addf %88, %94 : vector<8x16x8xf32>
    %c0_36 = arith.constant 0 : index
    %c0_37 = arith.constant 0 : index
    %96 = vector.load %arg7[%c0_36, %c0_37] : memref<1x8xf32, #tpu.memory_space<vmem>>, vector<1x8xf32>
    %97 = vector.shape_cast %96 : vector<1x8xf32> to vector<1x1x8xf32>
    %98 = vector.broadcast %97 : vector<1x1x8xf32> to vector<8x16x8xf32>
    %99 = arith.mulf %95, %98 : vector<8x16x8xf32>
    %c0_38 = arith.constant 0 : index
    %c0_39 = arith.constant 0 : index
    %100 = vector.load %arg8[%c0_38, %c0_39] : memref<1x8xf32, #tpu.memory_space<vmem>>, vector<1x8xf32>
    %101 = vector.shape_cast %100 : vector<1x8xf32> to vector<1x1x8xf32>
    %102 = vector.broadcast %101 : vector<1x1x8xf32> to vector<8x16x8xf32>
    %103 = arith.addf %99, %102 : vector<8x16x8xf32>
    %cst_40 = arith.constant 0.000000e+00 : f32
    %cst_41 = arith.constant 6.000000e+00 : f32
    %104 = vector.broadcast %cst_40 : f32 to vector<8x16x8xf32>
    %105 = arith.maximumf %104, %103 : vector<8x16x8xf32>
    %106 = vector.broadcast %cst_41 : f32 to vector<8x16x8xf32>
    %107 = arith.minimumf %106, %105 : vector<8x16x8xf32>
    %108 = vector.shape_cast %107 : vector<8x16x8xf32> to vector<128x8xf32>
    %c0_42 = arith.constant 0 : index
    %c0_43 = arith.constant 0 : index
    %109 = vector.load %arg9[%c0_42, %c0_43] : memref<8x8xf32, #tpu.memory_space<vmem>>, vector<8x8xf32>
    %cst_44 = arith.constant dense<0.000000e+00> : vector<128x8xf32>
    %110 = tpu.matmul %108, %109, %cst_44 {dimension_numbers = #tpu.dot_dimension_numbers<[1], [0], [0], [1], [0, 0, 1, 1], [], []>} : vector<128x8xf32>, vector<8x8xf32>, vector<128x8xf32> -> vector<128x8xf32>
    %c0_45 = arith.constant 0 : index
    %c0_46 = arith.constant 0 : index
    %111 = vector.load %arg10[%c0_45, %c0_46] : memref<1x8xf32, #tpu.memory_space<vmem>>, vector<1x8xf32>
    %112 = vector.broadcast %111 : vector<1x8xf32> to vector<128x8xf32>
    %113 = arith.mulf %110, %112 : vector<128x8xf32>
    %c0_47 = arith.constant 0 : index
    %c0_48 = arith.constant 0 : index
    %114 = vector.load %arg11[%c0_47, %c0_48] : memref<1x8xf32, #tpu.memory_space<vmem>>, vector<1x8xf32>
    %115 = vector.broadcast %114 : vector<1x8xf32> to vector<128x8xf32>
    %116 = arith.addf %113, %115 : vector<128x8xf32>
    %c1_i32_49 = arith.constant 1 : i32
    %117 = arith.addi %0, %c1_i32_49 : i32
    %c0_50 = arith.constant 0 : index
    %118 = arith.index_cast %117 : i32 to index
    %c0_51 = arith.constant 0 : index
    %c0_52 = arith.constant 0 : index
    %119 = vector.load %arg2[%c0_50, %118, %c0_51, %c0_52] : memref<1x18x16x4xf32, #tpu.memory_space<vmem>>, vector<1x8x16x4xf32>
    %120 = vector.shape_cast %119 : vector<1x8x16x4xf32> to vector<8x16x4xf32>
    %121 = vector.shape_cast %120 : vector<8x16x4xf32> to vector<128x4xf32>
    %c0_53 = arith.constant 0 : index
    %c0_54 = arith.constant 0 : index
    %122 = vector.load %arg12[%c0_53, %c0_54] : memref<4x8xf32, #tpu.memory_space<vmem>>, vector<4x8xf32>
    %cst_55 = arith.constant dense<0.000000e+00> : vector<128x8xf32>
    %123 = tpu.matmul %121, %122, %cst_55 {dimension_numbers = #tpu.dot_dimension_numbers<[1], [0], [0], [1], [0, 0, 1, 1], [], []>} : vector<128x4xf32>, vector<4x8xf32>, vector<128x8xf32> -> vector<128x8xf32>
    %c0_56 = arith.constant 0 : index
    %c0_57 = arith.constant 0 : index
    %124 = vector.load %arg13[%c0_56, %c0_57] : memref<1x8xf32, #tpu.memory_space<vmem>>, vector<1x8xf32>
    %125 = vector.broadcast %124 : vector<1x8xf32> to vector<128x8xf32>
    %126 = arith.mulf %123, %125 : vector<128x8xf32>
    %c0_58 = arith.constant 0 : index
    %c0_59 = arith.constant 0 : index
    %127 = vector.load %arg14[%c0_58, %c0_59] : memref<1x8xf32, #tpu.memory_space<vmem>>, vector<1x8xf32>
    %128 = vector.broadcast %127 : vector<1x8xf32> to vector<128x8xf32>
    %129 = arith.addf %126, %128 : vector<128x8xf32>
    %130 = arith.addf %116, %129 : vector<128x8xf32>
    %131 = tpu.transpose %130, [1, 0] : vector<128x8xf32> -> vector<8x128xf32>
    %c0_60 = arith.constant 0 : index
    %c0_61 = arith.constant 0 : index
    %c0_62 = arith.constant 0 : index
    %132 = vector.load %arg15[%c0_60, %c0_61, %c0_62] : memref<1x8x128xf32, #tpu.memory_space<vmem>>, vector<1x8x128xf32>
    %133 = vector.shape_cast %132 : vector<1x8x128xf32> to vector<8x128xf32>
    %134 = vector.shape_cast %131 : vector<8x128xf32> to vector<1x8x128xf32>
    tpu.vector_store %arg15[%c0_60, %c0_61, %c0_62], %134 {strides = array<i32>} : memref<1x8x128xf32, #tpu.memory_space<vmem>>, vector<1x8x128xf32>,
    return
  }
  func.func @transform_0(%arg0: i32, %arg1: i32) -> (i32, i32, i32, i32) {
    %c0_i32 = arith.constant 0 : i32
    %c0_i32_0 = arith.constant 0 : i32
    %c0_i32_1 = arith.constant 0 : i32
    %c0_i32_2 = arith.constant 0 : i32
    return %arg0, %c0_i32, %c0_i32_0, %c0_i32_1 : i32, i32, i32, i32
  }
  func.func @transform_1(%arg0: i32, %arg1: i32) -> (i32, i32) {
    %c0_i32 = arith.constant 0 : i32
    %c0_i32_0 = arith.constant 0 : i32
    %c0_i32_1 = arith.constant 0 : i32
    return %c0_i32, %c0_i32_0 : i32, i32
  }
  func.func @transform_2(%arg0: i32, %arg1: i32) -> (i32, i32) {
    %c0_i32 = arith.constant 0 : i32
    %c0_i32_0 = arith.constant 0 : i32
    %c0_i32_1 = arith.constant 0 : i32
    return %c0_i32, %c0_i32_0 : i32, i32
  }
  func.func @transform_3(%arg0: i32, %arg1: i32) -> (i32, i32) {
    %c0_i32 = arith.constant 0 : i32
    %c0_i32_0 = arith.constant 0 : i32
    %c0_i32_1 = arith.constant 0 : i32
    return %c0_i32, %c0_i32_0 : i32, i32
  }
  func.func @transform_4(%arg0: i32, %arg1: i32) -> (i32, i32) {
    %c0_i32 = arith.constant 0 : i32
    %c0_i32_0 = arith.constant 0 : i32
    %c0_i32_1 = arith.constant 0 : i32
    return %c0_i32, %c0_i32_0 : i32, i32
  }
  func.func @transform_5(%arg0: i32, %arg1: i32) -> (i32, i32) {
    %c0_i32 = arith.constant 0 : i32
    %c0_i32_0 = arith.constant 0 : i32
    %c0_i32_1 = arith.constant 0 : i32
    return %c0_i32, %c0_i32_0 : i32, i32
  }
  func.func @transform_6(%arg0: i32, %arg1: i32) -> (i32, i32) {
    %c0_i32 = arith.constant 0 : i32
    %c0_i32_0 = arith.constant 0 : i32
    %c0_i32_1 = arith.constant 0 : i32
    return %c0_i32, %c0_i32_0 : i32, i32
  }
  func.func @transform_7(%arg0: i32, %arg1: i32) -> (i32, i32) {
    %c0_i32 = arith.constant 0 : i32
    %c0_i32_0 = arith.constant 0 : i32
    %c0_i32_1 = arith.constant 0 : i32
    return %c0_i32, %c0_i32_0 : i32, i32
  }
  func.func @transform_8(%arg0: i32, %arg1: i32) -> (i32, i32) {
    %c0_i32 = arith.constant 0 : i32
    %c0_i32_0 = arith.constant 0 : i32
    %c0_i32_1 = arith.constant 0 : i32
    return %c0_i32, %c0_i32_0 : i32, i32
  }
  func.func @transform_9(%arg0: i32, %arg1: i32) -> (i32, i32) {
    %c0_i32 = arith.constant 0 : i32
    %c0_i32_0 = arith.constant 0 : i32
    %c0_i32_1 = arith.constant 0 : i32
    return %c0_i32, %c0_i32_0 : i32, i32
  }
  func.func @transform_10(%arg0: i32, %arg1: i32) -> (i32, i32) {
    %c0_i32 = arith.constant 0 : i32
    %c0_i32_0 = arith.constant 0 : i32
    %c0_i32_1 = arith.constant 0 : i32
    return %c0_i32, %c0_i32_0 : i32, i32
  }
  func.func @transform_11(%arg0: i32, %arg1: i32) -> (i32, i32) {
    %c0_i32 = arith.constant 0 : i32
    %c0_i32_0 = arith.constant 0 : i32
    %c0_i32_1 = arith.constant 0 : i32
    return %c0_i32, %c0_i32_0 : i32, i32
  }
  func.func @transform_12(%arg0: i32, %arg1: i32) -> (i32, i32) {
    %c0_i32 = arith.constant 0 : i32
    %c0_i32_0 = arith.constant 0 : i32
    %c0_i32_1 = arith.constant 0 : i32
    return %c0_i32, %c0_i32_0 : i32, i32
  }
  func.func @transform_13(%arg0: i32, %arg1: i32) -> (i32, i32, i32) {
    %c0_i32 = arith.constant 0 : i32
    %c0_i32_0 = arith.constant 0 : i32
    return %arg0, %c0_i32, %arg1 : i32, i32, i32
  }
}

</mosaic_0001>

<bundles_post_ra>
// kernel: tpu_custom_call.1
= control target key start
LH: loop header
LB: loop body
LE: loop exit
PB: predicated region body
PF: predicated region fallthrough
CT: control target
= control target key end

     0   :  { %s4183_s0 = inlined_call_operand.vmem [shape: f32[2,18,16,4], index: 0, kind: input, shape index: {}]   ;;  %s4184_s1 = inlined_call_operand.vmem [shape: f32[4,8], index: 1, kind: input, shape index: {}]   ;;  %s4185_s2 = inlined_call_operand.vmem [shape: f32[1,8], index: 2, kind: input, shape index: {}]   ;;  %s4186_s3 = inlined_call_operand.vmem [shape: f32[1,8], index: 3, kind: input, shape index: {}]   ;;  %s4187_s4 = inlined_call_operand.vmem [shape: f32[9,8], index: 4, kind: input, shape index: {}]   ;;  %s4188_s5 = inlined_call_operand.vmem [shape: f32[1,8], index: 5, kind: input, shape index: {}]   ;;  %s4189_s6 = inlined_call_operand.vmem [shape: f32[1,8], index: 6, kind: input, shape index: {}]   ;;  %s4190_s7 = inlined_call_operand.vmem [shape: f32[8,8], index: 7, kind: input, shape index: {}]   ;;  %s4191_s8 = inlined_call_operand.vmem [shape: f32[1,8], index: 8, kind: input, shape index: {}]   ;;  %s4192_s9 = inlined_call_operand.vmem [shape: f32[1,8], index: 9, kind: input, shape index: {}]   ;;  %s4193_s10 = inlined_call_operand.vmem [shape: f32[4,8], index: 10, kind: input, shape index: {}]   ;;  %s4194_s11 = inlined_call_operand.vmem [shape: f32[1,8], index: 11, kind: input, shape index: {}]   ;;  %s4195_s12 = inlined_call_operand.vmem [shape: f32[1,8], index: 12, kind: input, shape index: {}]   ;;  %s4196_s13 = inlined_call_operand.hbm [shape: f32[2,8,256], index: 13, kind: output, shape index: {}]  }
   0x1   :  { %4203 = sst [smem:[#allocation12_spill]] %s4183_s0 }
   0x2   :  { %4204 = sst [smem:[#allocation13_spill]] %s4196_s13 }
   0x3   :  { %18 = vsyncpa [#allocation4], 0 }
   0x4   :  { %20 = vsyncpa [#allocation4 + $0x1], 0  ;;  %s2987_s25 = smov 0   ;;  %s2989_s26 = smov 0  }
   0x5   :  { %s2991_s27 = smov 0   ;;  %s2993_s28 = smov 0  }
   0x6   :  { %s2995_s29 = smov 0   ;;  %s2997_s30 = smov 0  }
   0x7   :  { %s2999_s14 = smov 0   ;;  %s3001_s15 = smov 0  }
   0x8 LB: > { %4205 = sst [smem:[#allocation6_spill]] %s2883_s25  ;;  %s2477_s16 = sadd.s32 4294967295, %s2911_s15   ;;  %s2911_s15 = sphi %s3001_s15, %s26_s15   ;;  %s2907_s14 = sphi %s2999_s14, %s4222_s14   ;;  %s2903_s30 = sphi %s2997_s30, %s4221_s30   ;;  %s2899_s29 = sphi %s2995_s29, %s4220_s29   ;;  %s2895_s28 = sphi %s2993_s28, %s4219_s28   ;;  %s2891_s27 = sphi %s2991_s27, %s4225_s27   ;;  %s2887_s26 = sphi %s2989_s26, %s4224_s26   ;;  %s2883_s25 = sphi %s2987_s25, %s4223_s25  }
   0x9   : > { %4206 = sst [smem:[#allocation7_spill]] %s2903_s30  ;;  %s2478_s17 = sadd.s32 4294967294, %s2911_s15  }
   0xa   : > { %4207 = sst [smem:[#allocation8_spill]] %s2907_s14  ;;  %s35_s18 = sadd.s32 1, %s2903_s30 }
   0xb   : > { %p36_p0 = scmp.ge.s32.totalorder %s35_s18, 2  ;;  %s38_s19 = sadd.s32 1, %s2907_s14 }
   0xc   : > { %p335_p1 = scmp.ne.s32.totalorder %s2891_s27, %s2887_s26  ;;  %p336_p2 = scmp.eq.s32.totalorder %s2477_s16, 3 }
   0xd   : > { %s4227_s18 = smov (%p36_p0, %s35_s18), 0  ;;  %s4229_s19 = smov (!%p36_p0, %s38_s19), %s2907_s14 }
   0xe   : > { %4208 = sst [smem:[#allocation9_spill]] %s4227_s18  ;;  %s321_s20 = ssub.s32 %s2903_s30, %s4227_s18 }
   0xf   : > { %p3038_p3 = por %p336_p2, %p335_p1  ;;  %p40_p4 = scmp.ge.s32.totalorder %s4229_s19, 2 }
  0x10   : > { %p341_p5 = scmp.ne.s32.totalorder %s2887_s26, %s2883_s25  ;;  %p342_p6 = scmp.eq.s32.totalorder %s2478_s17, 3 }
  0x11   : > { %p2481_p7 = scmp.ge.s32.totalorder %s2911_s15, 1  ;;  %s4231_s19 = smov (%p40_p4, %s4229_s19), 0 }
  0x12   : > { %4210 = sst [smem:[#allocation10_spill]] %s4231_s19  ;;  %p3047_p8 = por %p342_p6, %p341_p5 }
  0x13   : > { %p404_p9 = scmp.lt.s32.totalorder %s2911_s15, 5  ;;  %s320_s23 = ssub.s32 %s2907_s14, %s4231_s19 }
  0x14   : > { %s325_s24 = sadd.s32 1, %s2891_s27  ;;  %s322_s16 = sor.u32 %s321_s20, %s320_s23 }
  0x15   : > { %p405_p10 = pnand %p2481_p7, %p404_p9  ;;  %p323_p11 = scmp.eq.s32.totalorder %s322_s16, 0 }
  0x16   : > { %s445_s17 = sand.u32 (!%p405_p10), 1, %s2887_s26   ;;  %v476_v0 = vld [vmem:[%s4184_s1] sm:$0xf] (!%p405_p10)  ;;  %vm538_vm0 = vcmask (!%p405_p10), 1043456   ;;  %p448_p12 = scmp.lt.s32.totalorder (!%p405_p10), %s2899_s29, 1  ;;  %vm477_vm1 = vcmask (!%p405_p10), 31744  }
  0x17   : > { %s3056_s18 = scalar_select %p323_p11, %s2891_s27, %s325_s24  }
  0x18   : > { %408 = sbr.rel (%p405_p10) target bundleno = 829 (0x33d), region = 72  ;;  %s3065_s20 = sshll.u32 (!%p405_p10), %s445_s17, 3  ;;  %2639 = vmatprep.subr.msk.mxu0 (!%p405_p10), %vm538_vm0, %v476_v0  ;;  %vm801_vm2 = vcmask (!%p405_p10), 57344   ;;  %v2913_v21 = vmov (!%p405_p10), 0.0   ;;  %v3140_v22 = vld [vmem:[%s4185_s2] ss:$0 sm:$0xff] (!%p405_p10) }
  0x19   : > { %4212 = sst [smem:[#allocation11_spill]] %s3056_s18  ;;  %2640 = vmatpush3.msk.msra.mxu0 (!%p405_p10), %vm538_vm0, %v476_v0  ;;  %s2582_s16 = sshll.u32 (!%p405_p10), %s2895_s28, 7  ;;  %802 = vst.msk [vmem:[#allocation2] sm:$0x1] (!%p405_p10), %vm801_vm2, %v2913_v21  ;;  %803 = vst.msk [vmem:[#allocation2 + $0x18] sm:$0x1] (!%p405_p10), %vm801_vm2, %v2913_v21 }
  0x1a   : > { %s4213_s0 = sld [smem:[#allocation12_spill]] (!%p405_p10)  ;;  %804 = vst.msk [vmem:[#allocation2 + $0x30] sm:$0x1] (!%p405_p10), %vm801_vm2, %v2913_v21  ;;  %805 = vst.msk [vmem:[#allocation2 + $0x48] sm:$0x1] (!%p405_p10), %vm801_vm2, %v2913_v21  ;;  %vm822_vm3 = vcmask (!%p405_p10), 64512  }
  0x1b   : > { %806 = vst.msk [vmem:[#allocation2 + $0x60] sm:$0x1] (!%p405_p10), %vm801_vm2, %v2913_v21  ;;  %807 = vst.msk [vmem:[#allocation2 + $0x78] sm:$0x1] (!%p405_p10), %vm801_vm2, %v2913_v21  ;;  %v3145_v24 = vld [vmem:[%s4186_s3] ss:$0 sm:$0xff] (!%p405_p10) }
  0x1c   : > { %808 = vst.msk [vmem:[#allocation2 + $0x90] sm:$0x1] (!%p405_p10), %vm801_vm2, %v2913_v21  ;;  %809 = vst.msk [vmem:[#allocation2 + $0xa8] sm:$0x1] (!%p405_p10), %vm801_vm2, %v2913_v21  ;;  %s447_s19 = scalar_lea.vmem (!%p405_p10), [#allocation3], %s3065_s20 }
  0x1d   : > { %810 = vst.msk [vmem:[#allocation2 + $0xc0] sm:$0x1] (!%p405_p10), %vm801_vm2, %v2913_v21  ;;  %811 = vst.msk [vmem:[#allocation2 + $0xd8] sm:$0x1] (!%p405_p10), %vm801_vm2, %v2913_v21 }
  0x1e   : > { %812 = vst.msk [vmem:[#allocation2 + $0x11] sm:$0x1] (!%p405_p10), %vm801_vm2, %v2913_v21  ;;  %813 = vst.msk [vmem:[#allocation2 + $0x29] sm:$0x1] (!%p405_p10), %vm801_vm2, %v2913_v21 }
  0x1f   : > { %s449_s23 = scalar_select %p448_p12, %s2899_s29, 1  ;;  %814 = vst.msk [vmem:[#allocation2 + $0x41] sm:$0x1] %vm801_vm2, %v2913_v21  ;;  %815 = vst.msk [vmem:[#allocation2 + $0x59] sm:$0x1] %vm801_vm2, %v2913_v21 }
  0x20   : > { %816 = vst.msk [vmem:[#allocation2 + $0x71] sm:$0x1] %vm801_vm2, %v2913_v21  ;;  %817 = vst.msk [vmem:[#allocation2 + $0x89] sm:$0x1] %vm801_vm2, %v2913_v21 }
  0x21   : > { %s2725_s24 = smul.u32 288, %s449_s23  ;;  %818 = vst.msk [vmem:[#allocation2 + $0xa1] sm:$0x1] %vm801_vm2, %v2913_v21  ;;  %819 = vst.msk [vmem:[#allocation2 + $0xb9] sm:$0x1] %vm801_vm2, %v2913_v21  ;;  %s4214_s23 = sshll.u32 %s2895_s28, 3 }
  0x22   : > { %820 = vst.msk [vmem:[#allocation2 + $0xd1] sm:$0x1] %vm801_vm2, %v2913_v21  ;;  %821 = vst.msk [vmem:[#allocation2 + $0xe9] sm:$0x1] %vm801_vm2, %v2913_v21  ;;  %p2509_p13 = scmp.ne.s32.totalorder %s4214_s23, 0 }
  0x23   : > { %s452_s30 = scalar_lea.vmem %s4213_s0, %s2725_s24  ;;  %vm849_vm4 = vcmask (!%p2509_p13), 58368  }
  0x24   : > { %s3075_s18 = scalar_lea.vmem %s452_s30, %s2582_s16 }
  0x25   : > { %v456_v1 = vld [vmem:[%s3075_s18] sm:$0xff]  ;;  %v457_v2 = vld [vmem:[%s3075_s18 + $0x8] sm:$0xff]  ;;  %v458_v3 = vld [vmem:[%s3075_s18 + $0x10] sm:$0xff] }
  0x26   : > { %2641 = vmatprep.mubr.msk.f32.mxu0 %vm477_vm1, %v456_v1  ;;  %v459_v4 = vld [vmem:[%s3075_s18 + $0x18] sm:$0xff]  ;;  %v460_v5 = vld [vmem:[%s3075_s18 + $0x20] sm:$0xff]  ;;  %v461_v6 = vld [vmem:[%s3075_s18 + $0x28] sm:$0xff] }
  0x27   : > { %2642 = vmatmul.mubr.msk.f32.vlgmr.msra.gmra.mrb[0].mxu0 %vm477_vm1, %v457_v2  ;;  %v462_v7 = vld [vmem:[%s3075_s18 + $0x30] sm:$0xff]  ;;  %v463_v8 = vld [vmem:[%s3075_s18 + $0x38] sm:$0xff]  ;;  %v464_v9 = vld [vmem:[%s3075_s18 + $0x40] sm:$0xff] }
  0x28   : > { %2644 = vmatprep.mubr.msk.f32.mxu0 %vm477_vm1, %v458_v3  ;;  %v465_v10 = vld [vmem:[%s3075_s18 + $0x48] sm:$0xff]  ;;  %v466_v11 = vld [vmem:[%s3075_s18 + $0x50] sm:$0xff]  ;;  %v467_v12 = vld [vmem:[%s3075_s18 + $0x58] sm:$0xff] }
  0x29   : > { %v468_v13 = vld [vmem:[%s3075_s18 + $0x60] sm:$0xff]  ;;  %v469_v14 = vld [vmem:[%s3075_s18 + $0x68] sm:$0xff]  ;;  %v470_v15 = vld [vmem:[%s3075_s18 + $0x70] sm:$0xff] }
  0x2a   : > { %v471_v16 = vld [vmem:[%s3075_s18 + $0x78] sm:$0xff]  ;;  %v472_v17 = vld [vmem:[%s3075_s18 + $0x80] sm:$0xff]  ;;  %v473_v18 = vld [vmem:[%s3075_s18 + $0x88] sm:$0xff] }
  0x2b   : > { %2645 = vmatmul.mubr.msk.f32.gmra.mrb[2].mxu0 %vm477_vm1, %v459_v4  ;;  %v474_v19 = vld [vmem:[%s3075_s18 + $0x90] sm:$0xff]  ;;  %v475_v20 = vld [vmem:[%s3075_s18 + $0x98] sm:$0xff] }
  0x2c   : > { %2647 = vmatprep.mubr.msk.f32.mxu0 %vm477_vm1, %v460_v5 }
  0x2f   : > { %2648 = vmatmul.mubr.msk.f32.gmra.mrb[4].mxu0 %vm477_vm1, %v461_v6 }
  0x30   : > { %2650 = vmatprep.mubr.msk.f32.mxu0 %vm477_vm1, %v462_v7 }
  0x33   : > { %2651 = vmatmul.mubr.msk.f32.gmra.mrb[6].mxu0 %vm477_vm1, %v463_v8 }
  0x34   : > { %2653 = vmatprep.mubr.msk.f32.mxu0 %vm477_vm1, %v464_v9 }
  0x37   : > { %2654 = vmatmul.mubr.msk.f32.gmra.mrb[8].mxu0 %vm477_vm1, %v465_v10 }
  0x38   : > { %2656 = vmatprep.mubr.msk.f32.mxu0 %vm477_vm1, %v466_v11 }
  0x3b   : > { %2657 = vmatmul.mubr.msk.f32.gmra.mrb[10].mxu0 %vm477_vm1, %v467_v12 }
  0x3c   : > { %2659 = vmatprep.mubr.msk.f32.mxu0 %vm477_vm1, %v468_v13 }
  0x3f   : > { %2660 = vmatmul.mubr.msk.f32.gmra.mrb[12].mxu0 %vm477_vm1, %v469_v14 }
  0x40   : > { %2662 = vmatprep.mubr.msk.f32.mxu0 %vm477_vm1, %v470_v15 }
  0x43   : > { %2663 = vmatmul.mubr.msk.f32.gmra.mrb[14].mxu0 %vm477_vm1, %v471_v16 }
  0x44   : > { %2665 = vmatprep.mubr.msk.f32.mxu0 %vm477_vm1, %v472_v17 }
  0x47   : > { %2666 = vmatmul.mubr.msk.f32.gmra.mrb[16].mxu0 %vm477_vm1, %v473_v18 }
  0x48   : > { %2668 = vmatprep.mubr.msk.f32.mxu0 %vm477_vm1, %v474_v19 }
  0x4b   : > { %2669 = vmatmul.mubr.msk.f32.gmra.mrb[18].mxu0 %vm477_vm1, %v475_v20 }
  0xfa   : > { %v2643_v23 = vpop.f32.mrb[0].mxu0 }
  0xfb   : > { %v715_v25 = vmul.f32 %v2643_v23, %v3140_v22  ;;  %v608_v26 = vpop.f32.mrb[1].mxu0 }
  0xfc   : > { %v714_v27 = vmul.f32 %v3140_v22, %v608_v26 }
  0xfd   : > { %v742_v28 = vadd.f32 %v3145_v24, %v715_v25 }
  0xfe   : > { %v741_v29 = vadd.f32 %v3145_v24, %v714_v27  ;;  %v2646_v30 = vpop.f32.mrb[2].mxu0 }
  0xff   : > { %v762_v31 = vmax.f32 %v742_v28, 0.0  ;;  %v717_v32 = vmul.f32 %v2646_v30, %v3140_v22  ;;  %v618_v33 = vpop.f32.mrb[3].mxu0 }
 0x100   : > { %v761_v34 = vmax.f32 %v741_v29, 0.0  ;;  %v716_v35 = vmul.f32 %v3140_v22, %v618_v33 }
 0x101   : > { %v782_v36 = vmin.f32 %v762_v31, 6.0  ;;  %v744_v37 = vadd.f32 %v3145_v24, %v717_v32 }
 0x102   : > { %v781_v38 = vmin.f32 %v761_v34, 6.0  ;;  %v743_v39 = vadd.f32 %v3145_v24, %v716_v35  ;;  %v2649_v40 = vpop.f32.mrb[4].mxu0 }
 0x103   : > { %824 = vst.msk [vmem:[#allocation2 + $0x9] sm:$0xff] %vm822_vm3, %v782_v36  ;;  %v764_v41 = vmax.f32 %v744_v37, 0.0  ;;  %v719_v42 = vmul.f32 %v2649_v40, %v3140_v22  ;;  %v628_v43 = vpop.f32.mrb[5].mxu0 }
 0x104   : > { %823 = vst.msk [vmem:[#allocation2 + $0x1] sm:$0xff] %vm822_vm3, %v781_v38  ;;  %v763_v44 = vmax.f32 %v743_v39, 0.0  ;;  %v718_v45 = vmul.f32 %v3140_v22, %v628_v43 }
 0x105   : > { %v784_v46 = vmin.f32 %v764_v41, 6.0  ;;  %v746_v47 = vadd.f32 %v3145_v24, %v719_v42 }
 0x106   : > { %v783_v48 = vmin.f32 %v763_v44, 6.0  ;;  %v745_v49 = vadd.f32 %v3145_v24, %v718_v45  ;;  %v2652_v50 = vpop.f32.mrb[6].mxu0 }
 0x107   : > { %826 = vst.msk [vmem:[#allocation2 + $0x21] sm:$0xff] %vm822_vm3, %v784_v46  ;;  %v766_v51 = vmax.f32 %v746_v47, 0.0  ;;  %v721_v52 = vmul.f32 %v2652_v50, %v3140_v22  ;;  %v638_v53 = vpop.f32.mrb[7].mxu0 }
 0x108   : > { %825 = vst.msk [vmem:[#allocation2 + $0x19] sm:$0xff] %vm822_vm3, %v783_v48  ;;  %v765_v54 = vmax.f32 %v745_v49, 0.0  ;;  %v720_v55 = vmul.f32 %v3140_v22, %v638_v53 }
 0x109   : > { %v786_v56 = vmin.f32 %v766_v51, 6.0  ;;  %v748_v57 = vadd.f32 %v3145_v24, %v721_v52 }
 0x10a   : > { %v785_v58 = vmin.f32 %v765_v54, 6.0  ;;  %v747_v59 = vadd.f32 %v3145_v24, %v720_v55  ;;  %v2655_v60 = vpop.f32.mrb[8].mxu0 }
 0x10b   : > { %828 = vst.msk [vmem:[#allocation2 + $0x39] sm:$0xff] %vm822_vm3, %v786_v56  ;;  %v768_v61 = vmax.f32 %v748_v57, 0.0  ;;  %v723_v62 = vmul.f32 %v2655_v60, %v3140_v22  ;;  %v648_v63 = vpop.f32.mrb[9].mxu0 }
 0x10c   : > { %827 = vst.msk [vmem:[#allocation2 + $0x31] sm:$0xff] %vm822_vm3, %v785_v58  ;;  %v767_v0 = vmax.f32 %v747_v59, 0.0  ;;  %v722_v1 = vmul.f32 %v3140_v22, %v648_v63 }
 0x10d   : > { %v788_v2 = vmin.f32 %v768_v61, 6.0  ;;  %v750_v3 = vadd.f32 %v3145_v24, %v723_v62 }
 0x10e   : > { %v787_v4 = vmin.f32 %v767_v0, 6.0  ;;  %v749_v5 = vadd.f32 %v3145_v24, %v722_v1  ;;  %v2658_v6 = vpop.f32.mrb[10].mxu0 }
 0x10f   : > { %830 = vst.msk [vmem:[#allocation2 + $0x51] sm:$0xff] %vm822_vm3, %v788_v2  ;;  %v770_v7 = vmax.f32 %v750_v3, 0.0  ;;  %v725_v8 = vmul.f32 %v2658_v6, %v3140_v22  ;;  %v658_v9 = vpop.f32.mrb[11].mxu0 }
 0x110   : > { %829 = vst.msk [vmem:[#allocation2 + $0x49] sm:$0xff] %vm822_vm3, %v787_v4  ;;  %v769_v10 = vmax.f32 %v749_v5, 0.0  ;;  %v724_v11 = vmul.f32 %v3140_v22, %v658_v9 }
 0x111   : > { %v790_v12 = vmin.f32 %v770_v7, 6.0  ;;  %v752_v13 = vadd.f32 %v3145_v24, %v725_v8 }
 0x112   : > { %v789_v14 = vmin.f32 %v769_v10, 6.0  ;;  %v751_v15 = vadd.f32 %v3145_v24, %v724_v11  ;;  %v2661_v16 = vpop.f32.mrb[12].mxu0 }
 0x113   : > { %832 = vst.msk [vmem:[#allocation2 + $0x69] sm:$0xff] %vm822_vm3, %v790_v12  ;;  %v772_v17 = vmax.f32 %v752_v13, 0.0  ;;  %v727_v18 = vmul.f32 %v2661_v16, %v3140_v22  ;;  %v668_v19 = vpop.f32.mrb[13].mxu0 }
 0x114   : > { %831 = vst.msk [vmem:[#allocation2 + $0x61] sm:$0xff] %vm822_vm3, %v789_v14  ;;  %v771_v20 = vmax.f32 %v751_v15, 0.0  ;;  %v726_v21 = vmul.f32 %v3140_v22, %v668_v19 }
 0x115   : > { %v792_v23 = vmin.f32 %v772_v17, 6.0  ;;  %v754_v25 = vadd.f32 %v3145_v24, %v727_v18 }
 0x116   : > { %v791_v26 = vmin.f32 %v771_v20, 6.0  ;;  %v753_v27 = vadd.f32 %v3145_v24, %v726_v21  ;;  %v2664_v28 = vpop.f32.mrb[14].mxu0 }
 0x117   : > { %834 = vst.msk [vmem:[#allocation2 + $0x81] sm:$0xff] %vm822_vm3, %v792_v23  ;;  %v774_v29 = vmax.f32 %v754_v25, 0.0  ;;  %v729_v30 = vmul.f32 %v2664_v28, %v3140_v22  ;;  %v678_v31 = vpop.f32.mrb[15].mxu0 }
 0x118   : > { %833 = vst.msk [vmem:[#allocation2 + $0x79] sm:$0xff] %vm822_vm3, %v791_v26  ;;  %v773_v32 = vmax.f32 %v753_v27, 0.0  ;;  %v728_v33 = vmul.f32 %v3140_v22, %v678_v31 }
 0x119   : > { %v794_v34 = vmin.f32 %v774_v29, 6.0  ;;  %v756_v35 = vadd.f32 %v3145_v24, %v729_v30 }
 0x11a   : > { %v793_v36 = vmin.f32 %v773_v32, 6.0  ;;  %v755_v37 = vadd.f32 %v3145_v24, %v728_v33  ;;  %v2667_v38 = vpop.f32.mrb[16].mxu0 }
 0x11b   : > { %836 = vst.msk [vmem:[#allocation2 + $0x99] sm:$0xff] %vm822_vm3, %v794_v34  ;;  %v776_v39 = vmax.f32 %v756_v35, 0.0  ;;  %v731_v40 = vmul.f32 %v2667_v38, %v3140_v22  ;;  %v688_v41 = vpop.f32.mrb[17].mxu0 }
 0x11c   : > { %835 = vst.msk [vmem:[#allocation2 + $0x91] sm:$0xff] %vm822_vm3, %v793_v36  ;;  %v775_v42 = vmax.f32 %v755_v37, 0.0  ;;  %v730_v43 = vmul.f32 %v3140_v22, %v688_v41 }
 0x11d   : > { %v796_v44 = vmin.f32 %v776_v39, 6.0  ;;  %v758_v45 = vadd.f32 %v3145_v24, %v731_v40 }
 0x11e   : > { %v795_v46 = vmin.f32 %v775_v42, 6.0  ;;  %v757_v47 = vadd.f32 %v3145_v24, %v730_v43  ;;  %v2670_v48 = vpop.f32.mrb[18].mxu0 }
 0x11f   : > { %838 = vst.msk [vmem:[#allocation2 + $0xb1] sm:$0xff] %vm822_vm3, %v796_v44  ;;  %v778_v49 = vmax.f32 %v758_v45, 0.0  ;;  %v733_v50 = vmul.f32 %v2670_v48, %v3140_v22  ;;  %v698_v51 = vpop.f32.mrb[19].mxu0 }
 0x120   : > { %837 = vst.msk [vmem:[#allocation2 + $0xa9] sm:$0xff] %vm822_vm3, %v795_v46  ;;  %v777_v52 = vmax.f32 %v757_v47, 0.0  ;;  %v732_v53 = vmul.f32 %v3140_v22, %v698_v51  ;;  %v2914_v22 = vmov (!%p2509_p13), 0.0  }
 0x121   : > { %v798_v54 = vmin.f32 %v778_v49, 6.0  ;;  %v760_v55 = vadd.f32 %v3145_v24, %v733_v50  ;;  %847 = vst.msk [vmem:[#allocation2] sm:$0xff] (!%p2509_p13), %vm822_vm3, %v2914_v22  ;;  %848 = vst.msk [vmem:[#allocation2 + $0x8] sm:$0xff] (!%p2509_p13), %vm822_vm3, %v2914_v22 }
 0x122   : > { %v797_v56 = vmin.f32 %v777_v52, 6.0  ;;  %v759_v57 = vadd.f32 %v3145_v24, %v732_v53  ;;  %846 = sbr.rel (%p2509_p13) target bundleno = 297 (0x129), region = 76  ;;  %850 = vst.msk [vmem:[#allocation2 + $0x10] sm:$0x3] (!%p2509_p13), %vm849_vm4, %v2914_v22 }
 0x123   : > { %840 = vst.msk [vmem:[#allocation2 + $0xc9] sm:$0xff] %vm822_vm3, %v798_v54  ;;  %v780_v58 = vmax.f32 %v760_v55, 0.0 }
 0x124   : > { %839 = vst.msk [vmem:[#allocation2 + $0xc1] sm:$0xff] %vm822_vm3, %v797_v56  ;;  %v779_v59 = vmax.f32 %v759_v57, 0.0 }
 0x125   : > { %v800_v60 = vmin.f32 %v780_v58, 6.0 }
 0x126   : > { %v799_v61 = vmin.f32 %v779_v59, 6.0 }
 0x127   : > { %842 = vst.msk [vmem:[#allocation2 + $0xe1] sm:$0xff] %vm822_vm3, %v800_v60 }
 0x128   : > { %841 = vst.msk [vmem:[#allocation2 + $0xd9] sm:$0xff] %vm822_vm3, %v799_v61 }
 0x129 PF: > { %s4215_s24 = sshll.u32 %s2895_s28, 3 }
 0x12a   : > { %s851_s16 = sadd.s32 10, %s4215_s24 }
 0x12b   : > { %p2510_p0 = scmp.ne.s32.totalorder %s851_s16, 18 }
 0x12c   : > { %vm859_vm5 = vcmask (!%p2510_p0), 58368   ;;  %v2915_v24 = vmov (!%p2510_p0), 0.0  }
 0x12d   : > { %855 = sbr.rel (%p2510_p0) target bundleno = 308 (0x134), region = 80  ;;  %857 = vst.msk [vmem:[#allocation2 + $0xd8] sm:$0xff] (!%p2510_p0), %vm822_vm3, %v2915_v24  ;;  %858 = vst.msk [vmem:[#allocation2 + $0xe0] sm:$0xff] (!%p2510_p0), %vm822_vm3, %v2915_v24 }
 0x12e   : > { %860 = vst.msk [vmem:[#allocation2 + $0xe8] sm:$0x3] (!%p2510_p0), %vm859_vm5, %v2915_v24 }
 0x134 PF: > { %v1832_v62 = vld [vmem:[%s4190_s7] sm:$0xff]  ;;  %v870_v63 = vld [vmem:[#allocation2 + $0x48] sm:$0xff]  ;;  %v871_v0 = vld [vmem:[#allocation2 + $0x50] sm:$0xff]  ;;  %vm981_vm6 = vcmask 1046528   ;;  %vm1107_vm7 = vcmask 1045504   ;;  %s2399_s25 = sshll.u32 %s447_s19, 4  ;;  %s4128_s25 = int_to_ptr.vmem [resolvable:$true] %s2399_s25 }
 0x135   : > { %2723 = vmatprep.subr.mxu1 %v1832_v62  ;;  %2671 = vmatprep.subr.mxu0 %v1832_v62  ;;  %v3219_v1 = vld [vmem:[#allocation2 + $0x60] sm:$0xff]  ;;  %v3250_v11 = vld [vmem:[#allocation2 + $0x68] sm:$0xff]  ;;  %v3277_v25 = vld [vmem:[#allocation2 + $0x78] sm:$0xff]  ;;  %s4216_s23 = sld [smem:[#allocation13_spill]]  ;;  %s2384_s0 = scalar_lea.sflag [#allocation4], %s445_s17 }
 0x136   : > { %2724 = vmatpush3.msra.mxu1 %v1832_v62  ;;  %v3224_v2 = vld [vmem:[%s4187_s4] ss:$0 sm:$0xff]  ;;  %v3229_v3 = vld [vmem:[%s4187_s4 + $0x1] ss:$0 sm:$0xff]  ;;  %2672 = vmatpush3.msra.mxu0 %v1832_v62  ;;  %v3237_v7 = vld [vmem:[%s4187_s4 + $0x2] ss:$0 sm:$0xff] }
 0x137   : > { %v902_v4 = vmul.f32 %v3224_v2, %v870_v63  ;;  %v942_v5 = vmul.f32 %v3229_v3, %v870_v63  ;;  %v943_v6 = vmul.f32 %v3229_v3, %v871_v0  ;;  %v3242_v8 = vld [vmem:[%s4187_s4 + $0x3] ss:$0 sm:$0xff]  ;;  %v3247_v9 = vld [vmem:[%s4187_s4 + $0x4] ss:$0 sm:$0xff]  ;;  %v903_v10 = vmul.f32 %v3224_v2, %v871_v0  ;;  %v3261_v16 = vld [vmem:[%s4187_s4 + $0x5] ss:$0 sm:$0xff] }
 0x138   : > { %v1068_v12 = vmul.f32 %v3237_v7, %v870_v63  ;;  %v1069_v13 = vmul.f32 %v3237_v7, %v871_v0  ;;  %v1191_v14 = vmul.f32 %v3242_v8, %v3219_v1  ;;  %v1231_v15 = vmul.f32 %v3247_v9, %v3219_v1  ;;  %v3266_v17 = vld [vmem:[%s4187_s4 + $0x6] ss:$0 sm:$0xff]  ;;  %v3275_v23 = vld [vmem:[%s4187_s4 + $0x7] ss:$0 sm:$0xff]  ;;  %v3284_v30 = vld [vmem:[%s4187_s4 + $0x8] ss:$0 sm:$0xff] }
 0x139   : > { %v997_v18 = vrot.slane %v942_v5, 1  ;;  %v998_v19 = vrot.slane %v943_v6, 1  ;;  %v1232_v20 = vmul.f32 %v3247_v9, %v3250_v11  ;;  %v1356_v21 = vmul.f32 %v3261_v16, %v3219_v1  ;;  %v3292_v35 = vld [vmem:[%s4193_s10] sm:$0xf]  ;;  %v872_v36 = vld [vmem:[#allocation2 + $0x58] sm:$0x3] }
 0x13a   : > { %v1123_v26 = vrot.slane %v1068_v12, 2  ;;  %v1124_v27 = vrot.slane %v1069_v13, 2  ;;  %v1285_v28 = vrot.slane %v1231_v15, 1  ;;  %v1357_v29 = vmul.f32 %v3261_v16, %v3250_v11  ;;  %v3294_v37 = vld [vmem:[#allocation2 + $0x80] sm:$0xff]  ;;  %2697 = vmatprep.subr.msk.mxu1 %vm538_vm0, %v3292_v35  ;;  %v3310_v53 = vld [vmem:[#allocation2 + $0x70] sm:$0x3] }
 0x13b   : > { %v999_v31 = vsel %vm981_vm6, %v997_v18, %v998_v19  ;;  %v1286_v32 = vrot.slane %v1232_v20, 1  ;;  %v1410_v33 = vrot.slane %v1356_v21, 2  ;;  %v1478_v34 = vmul.f32 %v3266_v17, %v3277_v25  ;;  %v3321_v62 = vld [vmem:[#allocation2 + $0x88] sm:$0x3] }
 0x13c   : > { %v1044_v38 = vadd.f32 %v999_v31, %v902_v4  ;;  %v1125_v39 = vsel %vm1107_vm7, %v1123_v26, %v1124_v27  ;;  %v1411_v40 = vrot.slane %v1357_v29, 2  ;;  %v1518_v41 = vmul.f32 %v3275_v23, %v3277_v25 }
 0x13d   : > { %v1287_v42 = vsel %vm981_vm6, %v1285_v28, %v1286_v32  ;;  %v1519_v43 = vmul.f32 %v3275_v23, %v3294_v37  ;;  %v1643_v44 = vmul.f32 %v3284_v30, %v3277_v25  ;;  %v1644_v45 = vmul.f32 %v3284_v30, %v3294_v37 }
 0x13e   : > { %v1170_v46 = vadd.f32 %v1125_v39, %v1044_v38  ;;  %v1412_v47 = vsel %vm1107_vm7, %v1410_v33, %v1411_v40  ;;  %v1572_v48 = vrot.slane %v1518_v41, 1  ;;  %v944_v49 = vmul.f32 %v3229_v3, %v872_v36 }
 0x13f   : > { %v1573_v50 = vrot.slane %v1519_v43, 1  ;;  %v1697_v51 = vrot.slane %v1643_v44, 2  ;;  %v1698_v52 = vrot.slane %v1644_v45, 2  ;;  %v1070_v54 = vmul.f32 %v3237_v7, %v872_v36 }
 0x140   : > { %v1207_v55 = vadd.f32 %v1191_v14, %v1170_v46  ;;  %v1000_v56 = vrot.slane %v944_v49, 1  ;;  %v1192_v57 = vmul.f32 %v3242_v8, %v3250_v11  ;;  %v1233_v58 = vmul.f32 %v3247_v9, %v3310_v53 }
 0x141   : > { %v1574_v59 = vsel %vm981_vm6, %v1572_v48, %v1573_v50  ;;  %v1699_v60 = vsel %vm1107_vm7, %v1697_v51, %v1698_v52  ;;  %v1126_v61 = vrot.slane %v1070_v54, 2  ;;  %v1358_v22 = vmul.f32 %v3261_v16, %v3310_v53 }
 0x142   : > { %v1332_v24 = vadd.f32 %v1287_v42, %v1207_v55  ;;  %v1001_v63 = vsel %vm981_vm6, %v998_v19, %v1000_v56  ;;  %v1288_v0 = vrot.slane %v1233_v58, 1  ;;  %v1479_v4 = vmul.f32 %v3266_v17, %v3294_v37  ;;  %v3353_v42 = vld [vmem:[%s4188_s5] ss:$0 sm:$0xff] }
 0x143   : > { %v1045_v5 = vadd.f32 %v1001_v63, %v903_v10  ;;  %v1127_v6 = vsel %vm1107_vm7, %v1124_v27, %v1126_v61  ;;  %v1413_v12 = vrot.slane %v1358_v22, 2  ;;  %v1520_v13 = vmul.f32 %v3275_v23, %v3321_v62  ;;  %v3378_v22 = vld [vmem:[#allocation2 + $0x98] sm:$0xff] }
 0x144   : > { %v1457_v14 = vadd.f32 %v1412_v47, %v1332_v24  ;;  %v1289_v15 = vsel %vm981_vm6, %v1286_v32, %v1288_v0  ;;  %v1645_v18 = vmul.f32 %v3284_v30, %v3321_v62  ;;  %v904_v19 = vmul.f32 %v3224_v2, %v3219_v1 }
 0x145   : > { %v1171_v20 = vadd.f32 %v1127_v6, %v1045_v5  ;;  %v1414_v21 = vsel %vm1107_vm7, %v1411_v40, %v1413_v12  ;;  %v1575_v26 = vrot.slane %v1520_v13, 1  ;;  %v945_v10 = vmul.f32 %v3229_v3, %v3219_v1 }
 0x146   : > { %v1494_v27 = vadd.f32 %v1478_v34, %v1457_v14  ;;  %v1700_v28 = vrot.slane %v1645_v18, 2  ;;  %v3339_v29 = vmul.f32 %v3229_v3, %v3250_v11  ;;  %v1071_v31 = vmul.f32 %v3237_v7, %v3219_v1 }
 0x147   : > { %v1208_v32 = vadd.f32 %v1192_v57, %v1171_v20  ;;  %v1576_v33 = vsel %vm981_vm6, %v1573_v50, %v1575_v26  ;;  %v1002_v36 = vrot.slane %v945_v10, 1  ;;  %v3346_v38 = vmul.f32 %v3237_v7, %v3250_v11  ;;  %v3368_v50 = vld [vmem:[%s4189_s6] ss:$0 sm:$0xff]  ;;  %v3374_v57 = vld [vmem:[#allocation2 + $0x90] sm:$0xff] }
 0x148   : > { %v1619_v39 = vadd.f32 %v1574_v59, %v1494_v27  ;;  %v1701_v40 = vsel %vm1107_vm7, %v1698_v52, %v1700_v28  ;;  %v1003_v34 = vrot.slane %v3339_v29, 1  ;;  %v1128_v41 = vrot.slane %v1071_v31, 2 }
 0x149   : > { %v1333_v1 = vadd.f32 %v1289_v15, %v1208_v32  ;;  %v1129_v43 = vrot.slane %v3346_v38, 2  ;;  %v1193_v44 = vmul.f32 %v3242_v8, %v3277_v25  ;;  %v1234_v45 = vmul.f32 %v3247_v9, %v3277_v25 }
 0x14a   : > { %v1744_v46 = vadd.f32 %v1699_v60, %v1619_v39  ;;  %v1004_v47 = vsel %vm981_vm6, %v1002_v36, %v1003_v34  ;;  %v1235_v48 = vmul.f32 %v3247_v9, %v3294_v37  ;;  %v1359_v49 = vmul.f32 %v3261_v16, %v3277_v25 }
 0x14b   : > { %v1458_v51 = vadd.f32 %v1414_v21, %v1333_v1  ;;  %v1046_v52 = vadd.f32 %v1004_v47, %v904_v19  ;;  %v1130_v54 = vsel %vm1107_vm7, %v1128_v41, %v1129_v43  ;;  %v1290_v55 = vrot.slane %v1234_v45, 1 }
 0x14c   : > { %v1767_v56 = vmul.f32 %v3353_v42, %v1744_v46  ;;  %v1291_v58 = vrot.slane %v1235_v48, 1  ;;  %v1360_v59 = vmul.f32 %v3261_v16, %v3294_v37  ;;  %v1415_v60 = vrot.slane %v1359_v49, 2  ;;  %v3410_v49 = vld [vmem:[#allocation2 + $0xa0] sm:$0x3] }
 0x14d   : > { %v1495_v61 = vadd.f32 %v1479_v4, %v1458_v51  ;;  %v1172_v24 = vadd.f32 %v1130_v54, %v1046_v52  ;;  %v1480_v63 = vmul.f32 %v3266_v17, %v3374_v57  ;;  %v1521_v0 = vmul.f32 %v3275_v23, %v3374_v57 }
 0x14e   : > { %v1790_v5 = vadd.f32 %v3368_v50, %v1767_v56  ;;  %v1292_v6 = vsel %vm981_vm6, %v1290_v55, %v1291_v58  ;;  %v1416_v12 = vrot.slane %v1360_v59, 2  ;;  %v1522_v13 = vmul.f32 %v3275_v23, %v3378_v22 }
 0x14f   : > { %v1620_v14 = vadd.f32 %v1576_v33, %v1495_v61  ;;  %v1209_v15 = vadd.f32 %v1193_v44, %v1172_v24  ;;  %v1577_v4 = vrot.slane %v1521_v0, 1  ;;  %v1646_v18 = vmul.f32 %v3284_v30, %v3374_v57 }
 0x150   : > { %v1806_v19 = vmax.f32 %v1790_v5, 0.0  ;;  %v1417_v20 = vsel %vm1107_vm7, %v1415_v60, %v1416_v12  ;;  %v1578_v21 = vrot.slane %v1522_v13, 1  ;;  %v1647_v26 = vmul.f32 %v3284_v30, %v3378_v22 }
 0x151   : > { %v1745_v10 = vadd.f32 %v1701_v40, %v1620_v14  ;;  %v1334_v27 = vadd.f32 %v1292_v6, %v1209_v15  ;;  %v1702_v28 = vrot.slane %v1646_v18, 2  ;;  %v905_v29 = vmul.f32 %v3224_v2, %v3250_v11 }
 0x152   : > { %v1822_v31 = vmin.f32 %v1806_v19, 6.0  ;;  %v1579_v32 = vsel %vm981_vm6, %v1577_v4, %v1578_v21  ;;  %v1703_v33 = vrot.slane %v1647_v26, 2  ;;  %v947_v36 = vmul.f32 %v3229_v3, %v3310_v53 }
 0x153   : > { %v1768_v39 = vmul.f32 %v3353_v42, %v1745_v10  ;;  %v1459_v41 = vadd.f32 %v1417_v20, %v1334_v27  ;;  %v1073_v1 = vmul.f32 %v3237_v7, %v3310_v53  ;;  %v1194_v40 = vmul.f32 %v3242_v8, %v3294_v37 }
 0x154   : > { %2682 = vmatprep.mubr.msk.f32.mxu1 %vm822_vm3, %v1822_v31  ;;  %v1704_v11 = vsel %vm1107_vm7, %v1702_v28, %v1703_v33  ;;  %v1005_v44 = vrot.slane %v947_v36, 1  ;;  %v1236_v45 = vmul.f32 %v3247_v9, %v3321_v62  ;;  %v1361_v46 = vmul.f32 %v3261_v16, %v3321_v62 }
 0x155   : > { %v1791_v47 = vadd.f32 %v3368_v50, %v1768_v39  ;;  %v1496_v48 = vadd.f32 %v1480_v63, %v1459_v41  ;;  %v1131_v53 = vrot.slane %v1073_v1, 2  ;;  %v1481_v51 = vmul.f32 %v3266_v17, %v3378_v22 }
 0x156   : > { %v1006_v52 = vsel %vm981_vm6, %v1003_v34, %v1005_v44  ;;  %v1293_v54 = vrot.slane %v1236_v45, 1  ;;  %v1418_v55 = vrot.slane %v1361_v46, 2  ;;  %v1523_v56 = vmul.f32 %v3275_v23, %v3410_v49 }
 0x157   : > { %v1807_v59 = vmax.f32 %v1791_v47, 0.0  ;;  %v1621_v60 = vadd.f32 %v1579_v32, %v1496_v48  ;;  %v1047_v61 = vadd.f32 %v1006_v52, %v905_v29  ;;  %v1132_v24 = vsel %vm1107_vm7, %v1129_v43, %v1131_v53  ;;  %v3461_v52 = vld [vmem:[#allocation2 + $0xb0] sm:$0xff] }
 0x158   : > { %v1294_v63 = vsel %vm981_vm6, %v1291_v58, %v1293_v54  ;;  %v1419_v0 = vsel %vm1107_vm7, %v1416_v12, %v1418_v55  ;;  %v1580_v5 = vrot.slane %v1523_v56, 1  ;;  %v1648_v34 = vmul.f32 %v3284_v30, %v3410_v49 }
 0x159   : > { %v1823_v6 = vmin.f32 %v1807_v59, 6.0  ;;  %v1746_v13 = vadd.f32 %v1704_v11, %v1621_v60  ;;  %v1173_v14 = vadd.f32 %v1132_v24, %v1047_v61  ;;  %v906_v15 = vmul.f32 %v3224_v2, %v3277_v25  ;;  %v3457_v11 = vld [vmem:[#allocation2 + $0xa8] sm:$0xff] }
 0x15a   : > { %v1581_v4 = vsel %vm981_vm6, %v1578_v21, %v1580_v5  ;;  %v1705_v18 = vrot.slane %v1648_v34, 2  ;;  %v948_v38 = vmul.f32 %v3229_v3, %v3277_v25  ;;  %v3431_v43 = vmul.f32 %v3229_v3, %v3294_v37 }
 0x15b   : > { %2683 = vmatmul.mubr.msk.f32.vlgmr.msra.gmra.mrb[0].mxu1 %vm822_vm3, %v1823_v6  ;;  %v1769_v58 = vmul.f32 %v3353_v42, %v1746_v13  ;;  %v1210_v12 = vadd.f32 %v1194_v40, %v1173_v14  ;;  %v1074_v19 = vmul.f32 %v3237_v7, %v3277_v25  ;;  %v3439_v20 = vmul.f32 %v3237_v7, %v3294_v37 }
 0x15c   : > { %2698 = vmatpush3.msk.msra.mxu1 %vm538_vm0, %v3292_v35  ;;  %v1706_v21 = vsel %vm1107_vm7, %v1703_v33, %v1705_v18  ;;  %v1007_v26 = vrot.slane %v948_v38, 1  ;;  %v1008_v10 = vrot.slane %v3431_v43, 1  ;;  %v1195_v27 = vmul.f32 %v3242_v8, %v3374_v57 }
 0x15d   : > { %v1792_v28 = vadd.f32 %v3368_v50, %v1769_v58  ;;  %v1335_v29 = vadd.f32 %v1294_v63, %v1210_v12  ;;  %v1133_v31 = vrot.slane %v1074_v19, 2  ;;  %v1134_v25 = vrot.slane %v3439_v20, 2 }
 0x15e   : > { %v1009_v32 = vsel %vm981_vm6, %v1007_v26, %v1008_v10  ;;  %v1237_v36 = vmul.f32 %v3247_v9, %v3374_v57  ;;  %v1238_v35 = vmul.f32 %v3247_v9, %v3378_v22  ;;  %v1362_v33 = vmul.f32 %v3261_v16, %v3374_v57  ;;  %v3489_v26 = vld [vmem:[#allocation2 + $0xb8] sm:$0x3] }
 0x15f   : > { %v1808_v39 = vmax.f32 %v1792_v28, 0.0  ;;  %v1460_v41 = vadd.f32 %v1419_v0, %v1335_v29  ;;  %v1048_v1 = vadd.f32 %v1009_v32, %v906_v15  ;;  %v1135_v40 = vsel %vm1107_vm7, %v1133_v31, %v1134_v25 }
 0x160   : > { %v1295_v44 = vrot.slane %v1237_v36, 1  ;;  %v1296_v45 = vrot.slane %v1238_v35, 1  ;;  %v1363_v46 = vmul.f32 %v3261_v16, %v3378_v22  ;;  %v1420_v47 = vrot.slane %v1362_v33, 2 }
 0x161   : > { %v1824_v48 = vmin.f32 %v1808_v39, 6.0  ;;  %v1497_v53 = vadd.f32 %v1481_v51, %v1460_v41  ;;  %v1174_v54 = vadd.f32 %v1135_v40, %v1048_v1  ;;  %v1482_v55 = vmul.f32 %v3266_v17, %v3457_v11 }
 0x162   : > { %v1297_v56 = vsel %vm981_vm6, %v1295_v44, %v1296_v45  ;;  %v1421_v59 = vrot.slane %v1363_v46, 2  ;;  %v1524_v60 = vmul.f32 %v3275_v23, %v3457_v11  ;;  %v1525_v61 = vmul.f32 %v3275_v23, %v3461_v52 }
 0x163   : > { %2685 = vmatprep.mubr.msk.f32.mxu1 %vm822_vm3, %v1824_v48  ;;  %v1622_v24 = vadd.f32 %v1581_v4, %v1497_v53  ;;  %v1211_v63 = vadd.f32 %v1195_v27, %v1174_v54  ;;  %v1649_v51 = vmul.f32 %v3284_v30, %v3457_v11  ;;  %v1650_v0 = vmul.f32 %v3284_v30, %v3461_v52 }
 0x164   : > { %v1422_v5 = vsel %vm1107_vm7, %v1420_v47, %v1421_v59  ;;  %v1582_v34 = vrot.slane %v1524_v60, 1  ;;  %v1583_v6 = vrot.slane %v1525_v61, 1  ;;  %v907_v13 = vmul.f32 %v3224_v2, %v3294_v37 }
 0x165   : > { %v1747_v14 = vadd.f32 %v1706_v21, %v1622_v24  ;;  %v1336_v15 = vadd.f32 %v1297_v56, %v1211_v63  ;;  %v1707_v18 = vrot.slane %v1649_v51, 2  ;;  %v1708_v38 = vrot.slane %v1650_v0, 2 }
 0x166   : > { %v1584_v4 = vsel %vm981_vm6, %v1582_v34, %v1583_v6  ;;  %v950_v43 = vmul.f32 %v3229_v3, %v3321_v62  ;;  %v1076_v58 = vmul.f32 %v3237_v7, %v3321_v62  ;;  %v1196_v12 = vmul.f32 %v3242_v8, %v3378_v22 }
 0x167   : > { %v1770_v19 = vmul.f32 %v3353_v42, %v1747_v14  ;;  %v1461_v20 = vadd.f32 %v1422_v5, %v1336_v15  ;;  %v1709_v37 = vsel %vm1107_vm7, %v1707_v18, %v1708_v38  ;;  %v1239_v21 = vmul.f32 %v3247_v9, %v3410_v49 }
 0x168   : > { %v1010_v27 = vrot.slane %v950_v43, 1  ;;  %v1136_v28 = vrot.slane %v1076_v58, 2  ;;  %v1364_v29 = vmul.f32 %v3261_v16, %v3410_v49  ;;  %v1483_v62 = vmul.f32 %v3266_v17, %v3461_v52 }
 0x169   : > { %v1793_v31 = vadd.f32 %v3368_v50, %v1770_v19  ;;  %v1498_v32 = vadd.f32 %v1482_v55, %v1461_v20  ;;  %v1298_v36 = vrot.slane %v1239_v21, 1  ;;  %v1526_v35 = vmul.f32 %v3275_v23, %v3489_v26 }
 0x16a   : > { %v1011_v33 = vsel %vm981_vm6, %v1008_v10, %v1010_v27  ;;  %v1137_v39 = vsel %vm1107_vm7, %v1134_v25, %v1136_v28  ;;  %v1423_v41 = vrot.slane %v1364_v29, 2  ;;  %v1651_v1 = vmul.f32 %v3284_v30, %v3489_v26 }
 0x16b   : > { %v1809_v40 = vmax.f32 %v1793_v31, 0.0  ;;  %v1623_v44 = vadd.f32 %v1584_v4, %v1498_v32  ;;  %v1049_v46 = vadd.f32 %v1011_v33, %v907_v13  ;;  %v1299_v47 = vsel %vm981_vm6, %v1296_v45, %v1298_v36  ;;  %v3535_v33 = vld [vmem:[#allocation2 + $0xc8] sm:$0xff] }
 0x16c   : > { %v1424_v48 = vsel %vm1107_vm7, %v1421_v59, %v1423_v41  ;;  %v1585_v53 = vrot.slane %v1526_v35, 1  ;;  %v1710_v54 = vrot.slane %v1651_v1, 2  ;;  %v908_v55 = vmul.f32 %v3224_v2, %v3374_v57 }
 0x16d   : > { %v1825_v56 = vmin.f32 %v1809_v40, 6.0  ;;  %v1748_v10 = vadd.f32 %v1709_v37, %v1623_v44  ;;  %v1175_v60 = vadd.f32 %v1137_v39, %v1049_v46  ;;  %v951_v25 = vmul.f32 %v3229_v3, %v3374_v57  ;;  %v3530_v37 = vld [vmem:[#allocation2 + $0xc0] sm:$0xff] }
 0x16e   : > { %v1586_v61 = vsel %vm981_vm6, %v1583_v6, %v1585_v53  ;;  %v1711_v24 = vsel %vm1107_vm7, %v1708_v38, %v1710_v54  ;;  %v952_v45 = vmul.f32 %v3229_v3, %v3378_v22  ;;  %v1077_v59 = vmul.f32 %v3237_v7, %v3374_v57 }
 0x16f   : > { %2686 = vmatmul.mubr.msk.f32.gmra.mrb[2].mxu1 %vm822_vm3, %v1825_v56  ;;  %v1771_v63 = vmul.f32 %v3353_v42, %v1748_v10  ;;  %v1212_v51 = vadd.f32 %v1196_v12, %v1175_v60  ;;  %v1012_v0 = vrot.slane %v951_v25, 1  ;;  %v1078_v5 = vmul.f32 %v3237_v7, %v3378_v22 }
 0x170   : > { %v1013_v34 = vrot.slane %v952_v45, 1  ;;  %v1138_v13 = vrot.slane %v1077_v59, 2  ;;  %v1197_v6 = vmul.f32 %v3242_v8, %v3457_v11  ;;  %v1240_v14 = vmul.f32 %v3247_v9, %v3457_v11 }
 0x171   : > { %v1794_v15 = vadd.f32 %v3368_v50, %v1771_v63  ;;  %v1337_v57 = vadd.f32 %v1299_v47, %v1212_v51  ;;  %v1139_v18 = vrot.slane %v1078_v5, 2  ;;  %v1241_v38 = vmul.f32 %v3247_v9, %v3461_v52 }
 0x172   : > { %v1014_v4 = vsel %vm981_vm6, %v1012_v0, %v1013_v34  ;;  %v1300_v43 = vrot.slane %v1240_v14, 1  ;;  %v1365_v58 = vmul.f32 %v3261_v16, %v3457_v11  ;;  %v1366_v12 = vmul.f32 %v3261_v16, %v3461_v52 }
 0x173   : > { %v1810_v19 = vmax.f32 %v1794_v15, 0.0  ;;  %v1462_v20 = vadd.f32 %v1424_v48, %v1337_v57  ;;  %v1050_v21 = vadd.f32 %v1014_v4, %v908_v55  ;;  %v1140_v27 = vsel %vm1107_vm7, %v1138_v13, %v1139_v18  ;;  %v3567_v4 = vld [vmem:[#allocation2 + $0xd0] sm:$0x3] }
 0x174   : > { %v1301_v28 = vrot.slane %v1241_v38, 1  ;;  %v1425_v29 = vrot.slane %v1365_v58, 2  ;;  %v1426_v31 = vrot.slane %v1366_v12, 2  ;;  %v1484_v32 = vmul.f32 %v3266_v17, %v3530_v37 }
 0x175   : > { %v1826_v36 = vmin.f32 %v1810_v19, 6.0  ;;  %v1499_v35 = vadd.f32 %v1483_v62, %v1462_v20  ;;  %v1176_v39 = vadd.f32 %v1140_v27, %v1050_v21  ;;  %v1527_v41 = vmul.f32 %v3275_v23, %v3530_v37 }
 0x176   : > { %v1302_v1 = vsel %vm981_vm6, %v1300_v43, %v1301_v28  ;;  %v1427_v40 = vsel %vm1107_vm7, %v1425_v29, %v1426_v31  ;;  %v1528_v44 = vmul.f32 %v3275_v23, %v3535_v33  ;;  %v1652_v46 = vmul.f32 %v3284_v30, %v3530_v37 }
 0x177   : > { %2688 = vmatprep.mubr.msk.f32.mxu1 %vm822_vm3, %v1826_v36  ;;  %v1624_v47 = vadd.f32 %v1586_v61, %v1499_v35  ;;  %v1213_v62 = vadd.f32 %v1197_v6, %v1176_v39  ;;  %v1587_v48 = vrot.slane %v1527_v41, 1  ;;  %v1653_v53 = vmul.f32 %v3284_v30, %v3535_v33 }
 0x178   : > { %v1588_v54 = vrot.slane %v1528_v44, 1  ;;  %v1712_v55 = vrot.slane %v1652_v46, 2  ;;  %v909_v56 = vmul.f32 %v3224_v2, %v3378_v22  ;;  %v953_v10 = vmul.f32 %v3229_v3, %v3410_v49 }
 0x179   : > { %v1749_v60 = vadd.f32 %v1711_v24, %v1624_v47  ;;  %v1338_v25 = vadd.f32 %v1302_v1, %v1213_v62  ;;  %v1713_v45 = vrot.slane %v1653_v53, 2  ;;  %v1079_v59 = vmul.f32 %v3237_v7, %v3410_v49 }
 0x17a   : > { %v1589_v61 = vsel %vm981_vm6, %v1587_v48, %v1588_v54  ;;  %v1015_v63 = vrot.slane %v953_v10, 1  ;;  %v1198_v51 = vmul.f32 %v3242_v8, %v3461_v52  ;;  %v1242_v0 = vmul.f32 %v3247_v9, %v3489_v26 }
 0x17b   : > { %v1772_v22 = vmul.f32 %v3353_v42, %v1749_v60  ;;  %v1463_v5 = vadd.f32 %v1427_v40, %v1338_v25  ;;  %v1714_v13 = vsel %vm1107_vm7, %v1712_v55, %v1713_v45  ;;  %v1141_v24 = vrot.slane %v1079_v59, 2 }
 0x17c   : > { %v1016_v6 = vsel %vm981_vm6, %v1013_v34, %v1015_v63  ;;  %v1303_v14 = vrot.slane %v1242_v0, 1  ;;  %v1367_v49 = vmul.f32 %v3261_v16, %v3489_v26  ;;  %v1485_v15 = vmul.f32 %v3266_v17, %v3535_v33 }
 0x17d   : > { %v1795_v57 = vadd.f32 %v3368_v50, %v1772_v22  ;;  %v1500_v38 = vadd.f32 %v1484_v32, %v1463_v5  ;;  %v1051_v43 = vadd.f32 %v1016_v6, %v909_v56  ;;  %v1142_v58 = vsel %vm1107_vm7, %v1139_v18, %v1141_v24  ;;  %v889_v24 = vld [vmem:[#allocation2 + $0xe0] sm:$0xff] }
 0x17e   : > { %v1304_v12 = vsel %vm981_vm6, %v1301_v28, %v1303_v14  ;;  %v1428_v19 = vrot.slane %v1367_v49, 2  ;;  %v1529_v34 = vmul.f32 %v3275_v23, %v3567_v4  ;;  %v1654_v20 = vmul.f32 %v3284_v30, %v3567_v4 }
 0x17f   : > { %v1811_v21 = vmax.f32 %v1795_v57, 0.0  ;;  %v1625_v27 = vadd.f32 %v1589_v61, %v1500_v38  ;;  %v1177_v29 = vadd.f32 %v1142_v58, %v1051_v43  ;;  %v910_v32 = vmul.f32 %v3224_v2, %v3457_v11 }
 0x180   : > { %v1429_v36 = vsel %vm1107_vm7, %v1426_v31, %v1428_v19  ;;  %v1590_v35 = vrot.slane %v1529_v34, 1  ;;  %v1715_v39 = vrot.slane %v1654_v20, 2  ;;  %v954_v18 = vmul.f32 %v3229_v3, %v3457_v11 }
 0x181   : > { %v1827_v28 = vmin.f32 %v1811_v21, 6.0  ;;  %v1750_v41 = vadd.f32 %v1714_v13, %v1625_v27  ;;  %v1214_v1 = vadd.f32 %v1198_v51, %v1177_v29  ;;  %v3582_v40 = vmul.f32 %v3229_v3, %v3461_v52 }
 0x182   : > { %v1591_v44 = vsel %vm981_vm6, %v1588_v54, %v1590_v35  ;;  %v1716_v46 = vsel %vm1107_vm7, %v1713_v45, %v1715_v39  ;;  %v1017_v47 = vrot.slane %v954_v18, 1  ;;  %v1080_v31 = vmul.f32 %v3237_v7, %v3457_v11  ;;  %v888_v45 = vld [vmem:[#allocation2 + $0xd8] sm:$0xff] }
 0x183   : > { %2689 = vmatmul.mubr.msk.f32.gmra.mrb[4].mxu1 %vm822_vm3, %v1827_v28  ;;  %v1773_v62 = vmul.f32 %v3353_v42, %v1750_v41  ;;  %v1339_v48 = vadd.f32 %v1304_v12, %v1214_v1  ;;  %v1018_v53 = vrot.slane %v3582_v40, 1  ;;  %v1081_v55 = vmul.f32 %v3237_v7, %v3461_v52  ;;  %v890_v1 = vld [vmem:[#allocation2 + $0xe8] sm:$0x3] }
 0x184   : > { %v1143_v56 = vrot.slane %v1080_v31, 2  ;;  %v1199_v54 = vmul.f32 %v3242_v8, %v3530_v37  ;;  %v1243_v10 = vmul.f32 %v3247_v9, %v3530_v37  ;;  %v1244_v11 = vmul.f32 %v3247_v9, %v3535_v33 }
 0x185   : > { %v1796_v60 = vadd.f32 %v3368_v50, %v1773_v62  ;;  %v1464_v25 = vadd.f32 %v1429_v36, %v1339_v48  ;;  %v1019_v59 = vsel %vm981_vm6, %v1017_v47, %v1018_v53  ;;  %v1144_v61 = vrot.slane %v1081_v55, 2 }
 0x186   : > { %v1052_v63 = vadd.f32 %v1019_v59, %v910_v32  ;;  %v1305_v51 = vrot.slane %v1243_v10, 1  ;;  %v1306_v0 = vrot.slane %v1244_v11, 1  ;;  %v1368_v22 = vmul.f32 %v3261_v16, %v3530_v37 }
 0x187   : > { %v1812_v5 = vmax.f32 %v1796_v60, 0.0  ;;  %v1501_v13 = vadd.f32 %v1485_v15, %v1464_v25  ;;  %v1145_v6 = vsel %vm1107_vm7, %v1143_v56, %v1144_v61  ;;  %v1369_v14 = vmul.f32 %v3261_v16, %v3535_v33 }
 0x188   : > { %v1178_v49 = vadd.f32 %v1145_v6, %v1052_v63  ;;  %v1307_v57 = vsel %vm981_vm6, %v1305_v51, %v1306_v0  ;;  %v1430_v38 = vrot.slane %v1368_v22, 2  ;;  %v1486_v43 = vmul.f32 %v3266_v17, %v888_v45  ;;  %v861_v63 = vld [vmem:[#allocation2] sm:$0xff]  ;;  %v862_v6 = vld [vmem:[#allocation2 + $0x8] sm:$0xff] }
 0x189   : > { %v1828_v58 = vmin.f32 %v1812_v5, 6.0  ;;  %v1626_v12 = vadd.f32 %v1591_v44, %v1501_v13  ;;  %v1431_v19 = vrot.slane %v1369_v14, 2  ;;  %v1530_v34 = vmul.f32 %v3275_v23, %v888_v45 }
 0x18a   : > { %v1215_v37 = vadd.f32 %v1199_v54, %v1178_v49  ;;  %v1531_v15 = vmul.f32 %v3275_v23, %v889_v24  ;;  %v1655_v20 = vmul.f32 %v3284_v30, %v888_v45  ;;  %v1656_v21 = vmul.f32 %v3284_v30, %v889_v24  ;;  %v3637_v49 = vld [vmem:[#allocation2 + $0x18] sm:$0xff] }
 0x18b   : > { %2691 = vmatprep.mubr.msk.f32.mxu1 %vm822_vm3, %v1828_v58  ;;  %v1751_v27 = vadd.f32 %v1716_v46, %v1626_v12  ;;  %v1432_v29 = vsel %vm1107_vm7, %v1430_v38, %v1431_v19  ;;  %v1592_v32 = vrot.slane %v1530_v34, 1  ;;  %v911_v36 = vmul.f32 %v3224_v2, %v3461_v52  ;;  %v3643_v58 = vld [vmem:[#allocation2 + $0x20] sm:$0xff] }
 0x18c   : > { %v1340_v35 = vadd.f32 %v1307_v57, %v1215_v37  ;;  %v1593_v39 = vrot.slane %v1531_v15, 1  ;;  %v1717_v18 = vrot.slane %v1655_v20, 2  ;;  %v1718_v28 = vrot.slane %v1656_v21, 2 }
 0x18d   : > { %v1774_v41 = vmul.f32 %v3353_v42, %v1751_v27  ;;  %v956_v40 = vmul.f32 %v3229_v3, %v3489_v26  ;;  %v1082_v44 = vmul.f32 %v3237_v7, %v3489_v26  ;;  %v1200_v46 = vmul.f32 %v3242_v8, %v3535_v33 }
 0x18e   : > { %v1465_v47 = vadd.f32 %v1432_v29, %v1340_v35  ;;  %v1594_v31 = vsel %vm981_vm6, %v1592_v32, %v1593_v39  ;;  %v1719_v52 = vsel %vm1107_vm7, %v1717_v18, %v1718_v28  ;;  %v1245_v62 = vmul.f32 %v3247_v9, %v3567_v4  ;;  %v3659_v18 = vld [vmem:[#allocation2 + $0x30] sm:$0xff] }
 0x18f   : > { %v1797_v48 = vadd.f32 %v3368_v50, %v1774_v41  ;;  %v1020_v55 = vrot.slane %v956_v40, 1  ;;  %v1146_v56 = vrot.slane %v1082_v44, 2  ;;  %v1370_v54 = vmul.f32 %v3261_v16, %v3567_v4 }
 0x190   : > { %v1502_v10 = vadd.f32 %v1486_v43, %v1465_v47  ;;  %v1308_v26 = vrot.slane %v1245_v62, 1  ;;  %v1487_v11 = vmul.f32 %v3266_v17, %v889_v24  ;;  %v1532_v33 = vmul.f32 %v3275_v23, %v890_v1 }
 0x191   : > { %v1813_v60 = vmax.f32 %v1797_v48, 0.0  ;;  %v1021_v25 = vsel %vm981_vm6, %v1018_v53, %v1020_v55  ;;  %v1147_v45 = vsel %vm1107_vm7, %v1144_v61, %v1146_v56  ;;  %v1433_v59 = vrot.slane %v1370_v54, 2 }
 0x192   : > { %v1627_v51 = vadd.f32 %v1594_v31, %v1502_v10  ;;  %v1053_v22 = vadd.f32 %v1021_v25, %v911_v36  ;;  %v1309_v5 = vsel %vm981_vm6, %v1306_v0, %v1308_v26  ;;  %v1595_v13 = vrot.slane %v1532_v33, 1 }
 0x193   : > { %v1829_v4 = vmin.f32 %v1813_v60, 6.0  ;;  %v1434_v14 = vsel %vm1107_vm7, %v1431_v19, %v1433_v59  ;;  %v1657_v24 = vmul.f32 %v3284_v30, %v890_v1  ;;  %v896_v57 = vmul.f32 %v3224_v2, %v861_v63 }
 0x194   : > { %v1752_v53 = vadd.f32 %v1719_v52, %v1627_v51  ;;  %v1179_v38 = vadd.f32 %v1147_v45, %v1053_v22  ;;  %v1596_v61 = vsel %vm981_vm6, %v1593_v39, %v1595_v13  ;;  %v933_v43 = vmul.f32 %v3229_v3, %v861_v63  ;;  %v3671_v52 = vld [vmem:[#allocation2 + $0x38] sm:$0xff]  ;;  %v863_v45 = vld [vmem:[#allocation2 + $0x10] sm:$0x3] }
 0x195   : > { %2692 = vmatmul.mubr.msk.f32.gmra.mrb[6].mxu1 %vm822_vm3, %v1829_v4  ;;  %v1720_v0 = vrot.slane %v1657_v24, 2  ;;  %v3646_v12 = vmul.f32 %v3229_v3, %v862_v6  ;;  %v1059_v19 = vmul.f32 %v3237_v7, %v861_v63  ;;  %v3650_v34 = vmul.f32 %v3237_v7, %v862_v6 }
 0x196   : > { %v1775_v37 = vmul.f32 %v3353_v42, %v1752_v53  ;;  %v1216_v15 = vadd.f32 %v1200_v46, %v1179_v38  ;;  %v982_v20 = vrot.slane %v933_v43, 1  ;;  %v1185_v21 = vmul.f32 %v3242_v8, %v3637_v49 }
 0x197   : > { %v1721_v27 = vsel %vm1107_vm7, %v1718_v28, %v1720_v0  ;;  %v983_v29 = vrot.slane %v3646_v12, 1  ;;  %v1108_v32 = vrot.slane %v1059_v19, 2  ;;  %v1109_v36 = vrot.slane %v3650_v34, 2 }
 0x198   : > { %v1798_v35 = vadd.f32 %v3368_v50, %v1775_v37  ;;  %v1341_v39 = vadd.f32 %v1309_v5, %v1216_v15  ;;  %v1222_v41 = vmul.f32 %v3247_v9, %v3637_v49  ;;  %v1223_v1 = vmul.f32 %v3247_v9, %v3643_v58 }
 0x199   : > { %v984_v40 = vsel %vm981_vm6, %v982_v20, %v983_v29  ;;  %v1110_v28 = vsel %vm1107_vm7, %v1108_v32, %v1109_v36  ;;  %v1347_v44 = vmul.f32 %v3261_v16, %v3637_v49  ;;  %v1348_v46 = vmul.f32 %v3261_v16, %v3643_v58 }
 0x19a   : > { %v1814_v47 = vmax.f32 %v1798_v35, 0.0  ;;  %v1466_v31 = vadd.f32 %v1434_v14, %v1341_v39  ;;  %v1038_v62 = vadd.f32 %v984_v40, %v896_v57  ;;  %v1270_v48 = vrot.slane %v1222_v41, 1  ;;  %v3688_v14 = vld [vmem:[#allocation2 + $0x28] sm:$0x3] }
 0x19b   : > { %v1271_v55 = vrot.slane %v1223_v1, 1  ;;  %v1395_v56 = vrot.slane %v1347_v44, 2  ;;  %v1396_v54 = vrot.slane %v1348_v46, 2  ;;  %v1472_v10 = vmul.f32 %v3266_v17, %v3659_v18 }
 0x19c   : > { %v1830_v26 = vmin.f32 %v1814_v47, 6.0  ;;  %v1503_v33 = vadd.f32 %v1487_v11, %v1466_v31  ;;  %v1164_v60 = vadd.f32 %v1110_v28, %v1038_v62  ;;  %v1509_v25 = vmul.f32 %v3275_v23, %v3659_v18 }
 0x19d   : > { %v1272_v59 = vsel %vm981_vm6, %v1270_v48, %v1271_v55  ;;  %v1397_v63 = vsel %vm1107_vm7, %v1395_v56, %v1396_v54  ;;  %v1510_v51 = vmul.f32 %v3275_v23, %v3671_v52  ;;  %v1634_v22 = vmul.f32 %v3284_v30, %v3659_v18 }
 0x19e   : > { %2694 = vmatprep.mubr.msk.f32.mxu1 %vm822_vm3, %v1830_v26  ;;  %v1628_v5 = vadd.f32 %v1596_v61, %v1503_v33  ;;  %v1201_v13 = vadd.f32 %v1185_v21, %v1164_v60  ;;  %v1557_v11 = vrot.slane %v1509_v25, 1  ;;  %v3686_v4 = vmul.f32 %v3284_v30, %v3671_v52  ;;  %v3698_v21 = vld [vmem:[#allocation2 + $0x40] sm:$0x3]  ;;  %v2542_v33 = vld [vmem:[%s3075_s18 + $0x10] sm:$0xff] }
 0x19f   : > { %v1558_v24 = vrot.slane %v1510_v51, 1  ;;  %v1682_v57 = vrot.slane %v1634_v22, 2  ;;  %v897_v53 = vmul.f32 %v3224_v2, %v862_v6  ;;  %v935_v38 = vmul.f32 %v3229_v3, %v863_v45 }
 0x1a0   : > { %v1753_v43 = vadd.f32 %v1721_v27, %v1628_v5  ;;  %v1326_v0 = vadd.f32 %v1272_v59, %v1201_v13  ;;  %v1683_v12 = vrot.slane %v3686_v4, 2  ;;  %v1061_v61 = vmul.f32 %v3237_v7, %v863_v45  ;;  %v3749_v5 = vld [vmem:[%s4187_s4 + $0x4] ss:$0 sm:$0xff]  ;;  %v3793_v4 = vld [vmem:[%s4187_s4 + $0x7] ss:$0 sm:$0xff] }
 0x1a1   : > { %v1559_v19 = vsel %vm981_vm6, %v1557_v11, %v1558_v24  ;;  %v985_v34 = vrot.slane %v935_v38, 1  ;;  %v1224_v37 = vmul.f32 %v3247_v9, %v3688_v14  ;;  %v1186_v27 = vmul.f32 %v3242_v8, %v3643_v58 }
 0x1a2   : > { %v1776_v15 = vmul.f32 %v3353_v42, %v1753_v43  ;;  %v1451_v20 = vadd.f32 %v1397_v63, %v1326_v0  ;;  %v1111_v6 = vrot.slane %v1061_v61, 2  ;;  %v1684_v32 = vsel %vm1107_vm7, %v1682_v57, %v1683_v12  ;;  %v2544_v57 = vld [vmem:[%s3075_s18 + $0x20] sm:$0xff] }
 0x1a3   : > { %v986_v35 = vsel %vm981_vm6, %v983_v29, %v985_v34  ;;  %v1273_v39 = vrot.slane %v1224_v37, 1  ;;  %v1349_v41 = vmul.f32 %v3261_v16, %v3688_v14  ;;  %v1473_v8 = vmul.f32 %v3266_v17, %v3671_v52 }
 0x1a4   : > { %v1799_v9 = vadd.f32 %v3368_v50, %v1776_v15  ;;  %v1488_v1 = vadd.f32 %v1472_v10, %v1451_v20  ;;  %v1039_v40 = vadd.f32 %v986_v35, %v897_v53  ;;  %v1112_v28 = vsel %vm1107_vm7, %v1109_v36, %v1111_v6 }
 0x1a5   : > { %v1398_v44 = vrot.slane %v1349_v41, 2  ;;  %v1511_v46 = vmul.f32 %v3275_v23, %v3698_v21  ;;  %v1636_v29 = vmul.f32 %v3284_v30, %v3698_v21  ;;  %v1274_v62 = vsel %vm981_vm6, %v1271_v55, %v1273_v39 }
 0x1a6   : > { %v1815_v47 = vmax.f32 %v1799_v9, 0.0  ;;  %v1613_v31 = vadd.f32 %v1559_v19, %v1488_v1  ;;  %v1165_v16 = vadd.f32 %v1112_v28, %v1039_v40  ;;  %v898_v36 = vmul.f32 %v3224_v2, %v3637_v49  ;;  %v3767_v19 = vld [vmem:[%s4187_s4 + $0x5] ss:$0 sm:$0xff]  ;;  %v3788_v28 = vld [vmem:[#allocation2 + $0x48] sm:$0xff] }
 0x1a7   : > { %v1399_v48 = vsel %vm1107_vm7, %v1396_v54, %v1398_v44  ;;  %v1560_v56 = vrot.slane %v1511_v46, 1  ;;  %v936_v17 = vmul.f32 %v3229_v3, %v3637_v49  ;;  %v3725_v30 = vmul.f32 %v3229_v3, %v3643_v58  ;;  %v2543_v3 = vld [vmem:[%s3075_s18 + $0x18] sm:$0xff]  ;;  %v2546_v44 = vld [vmem:[%s3075_s18 + $0x30] sm:$0xff] }
 0x1a8   : > { %v1831_v10 = vmin.f32 %v1815_v47, 6.0  ;;  %v1738_v23 = vadd.f32 %v1684_v32, %v1613_v31  ;;  %v1202_v26 = vadd.f32 %v1186_v27, %v1165_v16  ;;  %v1685_v60 = vrot.slane %v1636_v29, 2  ;;  %v2545_v32 = vld [vmem:[%s3075_s18 + $0x28] sm:$0xff]  ;;  %v3798_v46 = vld [vmem:[#allocation2 + $0x50] sm:$0xff] }
 0x1a9   : > { %v1561_v55 = vsel %vm981_vm6, %v1558_v24, %v1560_v56  ;;  %v987_v54 = vrot.slane %v936_v17, 1  ;;  %v1062_v25 = vmul.f32 %v3237_v7, %v3637_v49  ;;  %v988_v59 = vrot.slane %v3725_v30, 1  ;;  %v3742_v49 = vld [vmem:[%s4187_s4 + $0x3] ss:$0 sm:$0xff]  ;;  %v3807_v47 = vld [vmem:[%s4187_s4 + $0x8] ss:$0 sm:$0xff] }
 0x1aa   : > { %2695 = vmatmul.mubr.msk.f32.gmra.mrb[8].mxu1 %vm822_vm3, %v1831_v10  ;;  %v1761_v2 = vmul.f32 %v3353_v42, %v1738_v23  ;;  %v1327_v45 = vadd.f32 %v1274_v62, %v1202_v26  ;;  %v3735_v63 = vmul.f32 %v3237_v7, %v3643_v58  ;;  %v1187_v22 = vmul.f32 %v3742_v49, %v3659_v18  ;;  %v3823_v56 = vld [vmem:[%s4187_s4 + $0x6] ss:$0 sm:$0xff] }
 0x1ab   : > { %2699 = vmatprep.mubr.msk.f32.mxu1 %vm477_vm1, %v2542_v33  ;;  %v1113_v51 = vrot.slane %v1062_v25, 2  ;;  %v1225_v7 = vmul.f32 %v3749_v5, %v3659_v18  ;;  %v3755_v13 = vmul.f32 %v3749_v5, %v3671_v52  ;;  %v989_v53 = vsel %vm981_vm6, %v987_v54, %v988_v59  ;;  %v3835_v54 = vld [vmem:[%s4187_s4 + $0x1] ss:$0 sm:$0xff] }
 0x1ac   : > { %v1784_v11 = vadd.f32 %v3368_v50, %v1761_v2  ;;  %v1452_v24 = vadd.f32 %v1399_v48, %v1327_v45  ;;  %v1114_v38 = vrot.slane %v3735_v63, 2  ;;  %v1040_v43 = vadd.f32 %v989_v53, %v898_v36  ;;  %v3842_v2 = vld [vmem:[%s4187_s4 + $0x2] ss:$0 sm:$0xff] }
 0x1ad   : > { %v1275_v0 = vrot.slane %v1225_v7, 1  ;;  %v1276_v61 = vrot.slane %v3755_v13, 1  ;;  %v1350_v34 = vmul.f32 %v3767_v19, %v3659_v18  ;;  %v3777_v6 = vmul.f32 %v3767_v19, %v3671_v52  ;;  %v2551_v13 = vld [vmem:[%s3075_s18 + $0x58] sm:$0xff] }
 0x1ae   : > { %v1800_v37 = vmax.f32 %v1784_v11, 0.0  ;;  %v1489_v15 = vadd.f32 %v1473_v8, %v1452_v24  ;;  %2700 = vmatmul.mubr.msk.f32.vlgmr.msra.gmra.mrb[10].mxu1 %vm477_vm1, %v2543_v3  ;;  %v1115_v20 = vsel %vm1107_vm7, %v1113_v51, %v1114_v38  ;;  %v1686_v27 = vsel %vm1107_vm7, %v1683_v12, %v1685_v60  ;;  %v2548_v3 = vld [vmem:[%s3075_s18 + $0x40] sm:$0xff] }
 0x1af   : > { %2702 = vmatprep.mubr.msk.f32.mxu1 %vm477_vm1, %v2544_v57  ;;  %v1166_v35 = vadd.f32 %v1115_v20, %v1040_v43  ;;  %v1277_v39 = vsel %vm981_vm6, %v1275_v0, %v1276_v61  ;;  %v1400_v41 = vrot.slane %v1350_v34, 2  ;;  %v1401_v40 = vrot.slane %v3777_v6, 2 }
 0x1b0   : > { %v1816_v9 = vmin.f32 %v1800_v37, 6.0  ;;  %v1614_v1 = vadd.f32 %v1561_v55, %v1489_v15  ;;  %v1512_v12 = vmul.f32 %v3793_v4, %v3788_v28  ;;  %v3802_v29 = vmul.f32 %v3798_v46, %v3793_v4  ;;  %v2547_v55 = vld [vmem:[%s3075_s18 + $0x38] sm:$0xff] }
 0x1b1   : > { %v1203_v8 = vadd.f32 %v1187_v22, %v1166_v35  ;;  %v1637_v31 = vmul.f32 %v3807_v47, %v3788_v28  ;;  %v3813_v16 = vmul.f32 %v3807_v47, %v3798_v46  ;;  %v1402_v48 = vsel %vm1107_vm7, %v1400_v41, %v1401_v40  ;;  %v3853_v22 = vld [vmem:[%s4187_s4] ss:$0 sm:$0xff]  ;;  %v2550_v35 = vld [vmem:[%s3075_s18 + $0x50] sm:$0xff] }
 0x1b2   : > { %2673 = vmatprep.mubr.msk.f32.mxu0 %vm822_vm3, %v1816_v9  ;;  %v1739_v62 = vadd.f32 %v1686_v27, %v1614_v1  ;;  %2703 = vmatmul.mubr.msk.f32.gmra.mrb[12].mxu1 %vm477_vm1, %v2545_v32  ;;  %v1474_v36 = vmul.f32 %v3823_v56, %v3788_v28  ;;  %v1562_v17 = vrot.slane %v1512_v12, 1  ;;  %v1563_v23 = vrot.slane %v3802_v29, 1 }
 0x1b3   : > { %v1328_v10 = vadd.f32 %v1277_v39, %v1203_v8  ;;  %v1687_v26 = vrot.slane %v1637_v31, 2  ;;  %v1688_v33 = vrot.slane %v3813_v16, 2  ;;  %2705 = vmatprep.mubr.msk.f32.mxu1 %vm477_vm1, %v2546_v44  ;;  %v938_v25 = vmul.f32 %v3835_v54, %v3688_v14 }
 0x1b4   : > { %v1762_v60 = vmul.f32 %v3353_v42, %v1739_v62  ;;  %v1064_v45 = vmul.f32 %v3842_v2, %v3688_v14  ;;  %v1564_v42 = vsel %vm981_vm6, %v1562_v17, %v1563_v23  ;;  %v899_v7 = vmul.f32 %v3853_v22, %v3643_v58  ;;  %v3866_v58 = vld [vmem:[#allocation2 + $0x58] sm:$0x3] }
 0x1b5   : > { %v1453_v51 = vadd.f32 %v1402_v48, %v1328_v10  ;;  %v1227_v11 = vmul.f32 %v3749_v5, %v3698_v21  ;;  %v990_v24 = vrot.slane %v938_v25, 1  ;;  %v1352_v53 = vmul.f32 %v3767_v19, %v3698_v21  ;;  %v2552_v48 = vld [vmem:[%s3075_s18 + $0x60] sm:$0xff] }
 0x1b6   : > { %v1785_v14 = vadd.f32 %v3368_v50, %v1762_v60  ;;  %v1116_v57 = vrot.slane %v1064_v45, 2  ;;  %2706 = vmatmul.mubr.msk.f32.gmra.mrb[14].mxu1 %vm477_vm1, %v2547_v55  ;;  %v1689_v0 = vsel %vm1107_vm7, %v1687_v26, %v1688_v33  ;;  %v1514_v37 = vmul.f32 %v3866_v58, %v3793_v4  ;;  %v2549_v50 = vld [vmem:[%s3075_s18 + $0x48] sm:$0xff] }
 0x1b7   : > { %v1490_v43 = vadd.f32 %v1474_v36, %v1453_v51  ;;  %v1278_v34 = vrot.slane %v1227_v11, 1  ;;  %2708 = vmatprep.mubr.msk.f32.mxu1 %vm477_vm1, %v2548_v3  ;;  %v991_v20 = vsel %vm981_vm6, %v988_v59, %v990_v24  ;;  %v1403_v32 = vrot.slane %v1352_v53, 2  ;;  %v3913_v36 = vld [vmem:[%s4188_s5] ss:$0 sm:$0xff] }
 0x1b8   : > { %v1801_v15 = vmax.f32 %v1785_v14, 0.0  ;;  %v1117_v27 = vsel %vm1107_vm7, %v1114_v38, %v1116_v57  ;;  %v1041_v41 = vadd.f32 %v991_v20, %v899_v7  ;;  %v1188_v9 = vmul.f32 %v3742_v49, %v3671_v52  ;;  %v3924_v3 = vld [vmem:[%s4189_s6] ss:$0 sm:$0xff]  ;;  %v2553_v14 = vld [vmem:[%s3075_s18 + $0x68] sm:$0xff] }
 0x1b9   : > { %v1615_v39 = vadd.f32 %v1564_v42, %v1490_v43  ;;  %v1475_v1 = vmul.f32 %v3823_v56, %v3798_v46  ;;  %v1279_v30 = vsel %vm981_vm6, %v1276_v61, %v1278_v34  ;;  %v1565_v59 = vrot.slane %v1514_v37, 1 }
 0x1ba   : > { %v1817_v12 = vmin.f32 %v1801_v15, 6.0  ;;  %v1639_v63 = vmul.f32 %v3866_v58, %v3807_v47  ;;  %2709 = vmatmul.mubr.msk.f32.gmra.mrb[16].mxu1 %vm477_vm1, %v2549_v50  ;;  %v1167_v44 = vadd.f32 %v1117_v27, %v1041_v41  ;;  %v1404_v8 = vsel %vm1107_vm7, %v1401_v40, %v1403_v32 }
 0x1bb   : > { %v1740_v38 = vadd.f32 %v1689_v0, %v1615_v39  ;;  %v939_v31 = vmul.f32 %v3835_v54, %v3659_v18  ;;  %2711 = vmatprep.mubr.msk.f32.mxu1 %vm477_vm1, %v2550_v35  ;;  %v900_v61 = vmul.f32 %v3853_v22, %v3659_v18  ;;  %v3901_v62 = vmul.f32 %v3835_v54, %v3671_v52  ;;  %v2554_v0 = vld [vmem:[%s3075_s18 + $0x70] sm:$0xff] }
 0x1bc   : > { %2674 = vmatmul.mubr.msk.f32.vlgmr.msra.gmra.mrb[20].mxu0 %vm822_vm3, %v1817_v12  ;;  %v1065_v6 = vmul.f32 %v3842_v2, %v3659_v18  ;;  %v3907_v40 = vmul.f32 %v3842_v2, %v3671_v52  ;;  %v1204_v10 = vadd.f32 %v1188_v9, %v1167_v44  ;;  %v1690_v26 = vrot.slane %v1639_v63, 2  ;;  %v2814_v9 = vld [vmem:[#allocation2 + $0x60] sm:$0xff] }
 0x1bd   : > { %v1763_v17 = vmul.f32 %v3913_v36, %v1740_v38  ;;  %v992_v55 = vrot.slane %v939_v31, 1  ;;  %v993_v60 = vrot.slane %v3901_v62, 1  ;;  %v1189_v45 = vmul.f32 %v3788_v28, %v3742_v49  ;;  %v2556_v44 = vld [vmem:[%s3075_s18 + $0x80] sm:$0xff] }
 0x1be   : > { %v1118_v18 = vrot.slane %v1065_v6, 2  ;;  %v1119_v25 = vrot.slane %v3907_v40, 2  ;;  %2712 = vmatmul.mubr.msk.f32.gmra.mrb[18].mxu1 %vm477_vm1, %v2551_v13  ;;  %v1329_v42 = vadd.f32 %v1279_v30, %v1204_v10  ;;  %v1228_v7 = vmul.f32 %v3788_v28, %v3749_v5  ;;  %v2555_v30 = vld [vmem:[%s3075_s18 + $0x78] sm:$0xff] }
 0x1bf   : > { %v1786_v51 = vadd.f32 %v3924_v3, %v1763_v17  ;;  %v3931_v11 = vmul.f32 %v3798_v46, %v3749_v5  ;;  %2714 = vmatprep.mubr.msk.f32.mxu1 %vm477_vm1, %v2552_v48  ;;  %v994_v24 = vsel %vm981_vm6, %v992_v55, %v993_v60  ;;  %v1353_v53 = vmul.f32 %v3788_v28, %v3767_v19  ;;  %v2557_v55 = vld [vmem:[%s3075_s18 + $0x88] sm:$0xff]  ;;  %s2578_s18 = sshll.u32 %s2899_s29, 1  ;;  %s2817_s29 = scalar_lea.vmem %s4128_s25, 128 }
 0x1c0   : > { %v1120_v57 = vsel %vm1107_vm7, %v1118_v18, %v1119_v25  ;;  %v3945_v43 = vmul.f32 %v3798_v46, %v3767_v19  ;;  %v1454_v37 = vadd.f32 %v1404_v8, %v1329_v42  ;;  %v1042_v50 = vadd.f32 %v994_v24, %v900_v61  ;;  %s2395_s16 = sadd.s32 %s2895_s28, %s2578_s18  ;;  %p2818_p1 = scmp.ne.s32.totalorder %s4128_s25, %s2817_s29 }
 0x1c1   : > { %v1802_v34 = vmax.f32 %v1786_v51, 0.0  ;;  %v1280_v15 = vrot.slane %v1228_v7, 1  ;;  %v1566_v20 = vsel %vm981_vm6, %v1563_v23, %v1565_v59  ;;  %v1281_v27 = vrot.slane %v3931_v11, 1  ;;  %v2815_v59 = vld [vmem:[#allocation2 + $0x68] sm:$0xff]  ;;  %s2579_s13 = sshll.u32 %s2395_s16, 7  ;;  %s2916_s28 = smov [#allocation3]  }
 0x1c2   : > { %v1405_v32 = vrot.slane %v1353_v53, 2  ;;  %v1406_v28 = vrot.slane %v3945_v43, 2  ;;  %2715 = vmatmul.mubr.msk.f32.gmra.mrb[20].mxu1 %vm477_vm1, %v2553_v14  ;;  %v1491_v39 = vadd.f32 %v1475_v1, %v1454_v37  ;;  %v1168_v41 = vadd.f32 %v1120_v57, %v1042_v50  ;;  %v2816_v43 = vld [vmem:[#allocation2 + $0x70] sm:$0x3]  ;;  %s4126_s24 = scalar_lea.hbm %s4216_s23, %s2579_s13  ;;  %p2819_p2 = pnand %p2818_p1, %p3038_p3 }
 0x1c3   : > { %v1818_v35 = vmin.f32 %v1802_v34, 6.0  ;;  %v1515_v12 = vmul.f32 %v2814_v9, %v3793_v4  ;;  %2717 = vmatprep.mubr.msk.f32.mxu1 %vm477_vm1, %v2554_v0  ;;  %v1691_v29 = vsel %vm1107_vm7, %v1688_v33, %v1690_v26  ;;  %v1282_v23 = vsel %vm981_vm6, %v1280_v15, %v1281_v27  ;;  %s2821_s18 = sshll.u32 %s2916_s28, 4  ;;  %s2822_s18 = int_to_ptr.vmem [resolvable:$false] %s2821_s18 }
 0x1c4   : > { %v1516_v63 = vmul.f32 %v2815_v59, %v3793_v4  ;;  %v1640_v38 = vmul.f32 %v2814_v9, %v3807_v47  ;;  %v1616_v1 = vadd.f32 %v1566_v20, %v1491_v39  ;;  %v1205_v8 = vadd.f32 %v1189_v45, %v1168_v41  ;;  %p2820_p4 = pneg %p2819_p2  ;;  %s2823_s16 = scalar_lea.vmem %s2822_s18, 256 }
 0x1c5   : > { %2676 = vmatprep.mubr.msk.f32.mxu0 %vm822_vm3, %v1818_v35  ;;  %v1567_v31 = vrot.slane %v1515_v12, 1  ;;  %v1641_v13 = vmul.f32 %v2815_v59, %v3807_v47  ;;  %v1407_v16 = vsel %vm1107_vm7, %v1405_v32, %v1406_v28  ;;  %v1476_v33 = vmul.f32 %v2814_v9, %v3823_v56  ;;  %p2824_p5 = scmp.lt.s32.totalorder %s4128_s25, %s2822_s18  ;;  %p2825_p6 = scmp.lt.s32.totalorder %s2823_s16, %s2817_s29 }
 0x1c6   : > { %v1568_v61 = vrot.slane %v1516_v63, 1  ;;  %v941_v6 = vmul.f32 %v3835_v54, %v3698_v21  ;;  %2718 = vmatmul.mubr.msk.f32.gmra.mrb[22].mxu1 %vm477_vm1, %v2555_v30  ;;  %v1741_v48 = vadd.f32 %v1691_v29, %v1616_v1  ;;  %v1330_v17 = vadd.f32 %v1282_v23, %v1205_v8 }
 0x1c7   : > { %v901_v10 = vmul.f32 %v3853_v22, %v3671_v52  ;;  %v1067_v26 = vmul.f32 %v3842_v2, %v3698_v21  ;;  %2720 = vmatprep.mubr.msk.f32.mxu1 %vm477_vm1, %v2556_v44  ;;  %v1692_v18 = vrot.slane %v1640_v38, 2  ;;  %v1693_v45 = vrot.slane %v1641_v13, 2  ;;  %p2826_p7 = por %p2825_p6, %p2824_p5 }
 0x1c8   : > { %v995_v51 = vrot.slane %v941_v6, 1  ;;  %v1230_v42 = vmul.f32 %v3866_v58, %v3749_v5  ;;  %v1764_v54 = vmul.f32 %v3913_v36, %v1741_v48  ;;  %v1455_v7 = vadd.f32 %v1407_v16, %v1330_v17 }
 0x1c9   : > { %v1569_v11 = vsel %vm981_vm6, %v1567_v31, %v1568_v61  ;;  %v1121_v14 = vrot.slane %v1067_v26, 2  ;;  %v1190_v21 = vmul.f32 %v3798_v46, %v3742_v49  ;;  %v1355_v22 = vmul.f32 %v3866_v58, %v3767_v19  ;;  %v4024_v26 = vld [vmem:[%s4194_s11] ss:$0 sm:$0xff]  ;;  %p2827_p9 = pnand %p2826_p7, %p2820_p4 }
 0x1ca   : > { %v996_v52 = vsel %vm981_vm6, %v993_v60, %v995_v51  ;;  %v1283_v2 = vrot.slane %v1230_v42, 1  ;;  %2721 = vmatmul.mubr.msk.f32.gmra.mrb[24].mxu1 %vm477_vm1, %v2557_v55  ;;  %v1787_v5 = vadd.f32 %v3924_v3, %v1764_v54  ;;  %v1492_v24 = vadd.f32 %v1476_v33, %v1455_v7  ;;  %v4035_v42 = vld [vmem:[%s4192_s9] ss:$0 sm:$0xff] }
 0x1cb   : > { %v1043_v57 = vadd.f32 %v996_v52, %v901_v10  ;;  %v1122_v53 = vsel %vm1107_vm7, %v1119_v25, %v1121_v14  ;;  %v1694_v62 = vsel %vm1107_vm7, %v1692_v18, %v1693_v45  ;;  %v1408_v60 = vrot.slane %v1355_v22, 2  ;;  %v4019_v10 = vld [vmem:[%s4191_s8] ss:$0 sm:$0xff] }
 0x1cc   : > { %v1517_v49 = vmul.f32 %v2816_v43, %v3793_v4  ;;  %v1803_v46 = vmax.f32 %v1787_v5, 0.0  ;;  %v1617_v0 = vadd.f32 %v1569_v11, %v1492_v24  ;;  %v1284_v19 = vsel %vm981_vm6, %v1281_v27, %v1283_v2  ;;  %v4041_v7 = vld [vmem:[%s4195_s12] ss:$0 sm:$0xff] }
 0x1cd   : > { %v1169_v34 = vadd.f32 %v1122_v53, %v1043_v57  ;;  %v1642_v58 = vmul.f32 %v2816_v43, %v3807_v47  ;;  %v1409_v40 = vsel %vm1107_vm7, %v1406_v28, %v1408_v60  ;;  %v1477_v4 = vmul.f32 %v2815_v59, %v3823_v56 }
 0x1ce   : > { %v1819_v37 = vmin.f32 %v1803_v46, 6.0  ;;  %v1742_v50 = vadd.f32 %v1694_v62, %v1617_v0  ;;  %v1570_v20 = vrot.slane %v1517_v49, 1 }
 0x1cf   : > { %v1206_v15 = vadd.f32 %v1190_v21, %v1169_v34  ;;  %v1695_v35 = vrot.slane %v1642_v58, 2 }
 0x1d0   : > { %2677 = vmatmul.mubr.msk.f32.gmra.mrb[22].mxu0 %vm822_vm3, %v1819_v37  ;;  %v1765_v25 = vmul.f32 %v3913_v36, %v1742_v50  ;;  %v1571_v27 = vsel %vm981_vm6, %v1568_v61, %v1570_v20 }
 0x1d1   : > { %v1331_v32 = vadd.f32 %v1284_v19, %v1206_v15  ;;  %v1696_v12 = vsel %vm1107_vm7, %v1693_v45, %v1695_v35 }
 0x1d2   : > { %v1788_v39 = vadd.f32 %v3924_v3, %v1765_v25 }
 0x1d3   : > { %v1456_v41 = vadd.f32 %v1409_v40, %v1331_v32 }
 0x1d4   : > { %v1804_v47 = vmax.f32 %v1788_v39, 0.0 }
 0x1d5   : > { %v1493_v9 = vadd.f32 %v1477_v4, %v1456_v41 }
 0x1d6   : > { %v1820_v30 = vmin.f32 %v1804_v47, 6.0 }
 0x1d7   : > { %v1618_v28 = vadd.f32 %v1571_v27, %v1493_v9 }
 0x1d8   : > { %2679 = vmatprep.mubr.msk.f32.mxu0 %vm822_vm3, %v1820_v30 }
 0x1d9   : > { %v1743_v29 = vadd.f32 %v1696_v12, %v1618_v28 }
 0x1db   : > { %v1766_v23 = vmul.f32 %v3913_v36, %v1743_v29 }
 0x1dd   : > { %v1789_v63 = vadd.f32 %v3924_v3, %v1766_v23 }
 0x1df   : > { %v1805_v56 = vmax.f32 %v1789_v63, 0.0 }
 0x1e1   : > { %v1821_v59 = vmin.f32 %v1805_v56, 6.0 }
 0x1e3   : > { %2680 = vmatmul.mubr.msk.f32.gmra.mrb[24].mxu0 %vm822_vm3, %v1821_v59 }
 0x22e   : > { %v2684_v38 = vpop.f32.mrb[0].mxu1 }
 0x22f   : > { %v1977_v44 = vpop.f32.mrb[1].mxu1  ;;  %v2040_v45 = vmul.f32 %v2684_v38, %v4019_v10 }
 0x230   : > { %v2039_v51 = vmul.f32 %v4019_v10, %v1977_v44 }
 0x231   : > { %v2063_v2 = vadd.f32 %v4035_v42, %v2040_v45 }
 0x232   : > { %v2062_v22 = vadd.f32 %v4035_v42, %v2039_v51 }
 0x242   : > { %v2687_v1 = vpop.f32.mrb[2].mxu1 }
 0x243   : > { %v1987_v8 = vpop.f32.mrb[3].mxu1  ;;  %v2042_v57 = vmul.f32 %v2687_v1, %v4019_v10 }
 0x244   : > { %v2041_v49 = vmul.f32 %v4019_v10, %v1987_v8 }
 0x245   : > { %v2065_v32 = vadd.f32 %v4035_v42, %v2042_v57 }
 0x246   : > { %v2064_v41 = vadd.f32 %v4035_v42, %v2041_v49 }
 0x256   : > { %v2690_v31 = vpop.f32.mrb[4].mxu1 }
 0x257   : > { %v1997_v13 = vpop.f32.mrb[5].mxu1  ;;  %v2044_v4 = vmul.f32 %v2690_v31, %v4019_v10 }
 0x258   : > { %v2043_v27 = vmul.f32 %v4019_v10, %v1997_v13 }
 0x259   : > { %v2067_v56 = vadd.f32 %v4035_v42, %v2044_v4 }
 0x25a   : > { %v2066_v44 = vadd.f32 %v4035_v42, %v2043_v27 }
 0x268   : > { %v2693_v16 = vpop.f32.mrb[6].mxu1 }
 0x269   : > { %v2007_v33 = vpop.f32.mrb[7].mxu1  ;;  %v2046_v59 = vmul.f32 %v2693_v16, %v4019_v10 }
 0x26a   : > { %v2045_v1 = vmul.f32 %v4019_v10, %v2007_v33 }
 0x26c   : > { %v2068_v33 = vadd.f32 %v4035_v42, %v2045_v1 }
 0x27d   : > { %v4008_v61 = vpop.f32.mrb[8].mxu1 }
 0x27e   : > { %v4010_v6 = vpop.f32.mrb[9].mxu1  ;;  %v2048_v16 = vmul.f32 %v4008_v61, %v4019_v10 }
 0x281   : > { %v2701_v48 = vpop.f32.mrb[10].mxu1 }
 0x282   : > { %v2209_v36 = vpop.f32.mrb[11].mxu1  ;;  %v2296_v54 = vmul.f32 %v2701_v48, %v4024_v26 }
 0x283   : > { %v2295_v11 = vmul.f32 %v4024_v26, %v2209_v36 }
 0x284   : > { %v2319_v60 = vadd.f32 %v4041_v7, %v2296_v54  ;;  %v2069_v54 = vadd.f32 %v4035_v42, %v2046_v59 }
 0x285   : > { %v4012_v17 = vpop.f32.mrb[12].mxu1  ;;  %v2318_v0 = vadd.f32 %v4041_v7, %v2295_v11 }
 0x286   : > { %v4014_v3 = vpop.f32.mrb[13].mxu1 }
 0x289   : > { %v4026_v55 = vpop.f32.mrb[14].mxu1 }
 0x28a   : > { %v4028_v18 = vpop.f32.mrb[15].mxu1 }
 0x28b   : > { %v2299_v4 = vmul.f32 %v4024_v26, %v4028_v18 }
 0x28d   : > { %v2710_v14 = vpop.f32.mrb[16].mxu1 }
 0x28e   : > { %v2302_v52 = vmul.f32 %v2710_v14, %v4024_v26  ;;  %v2239_v21 = vpop.f32.mrb[17].mxu1  ;;  %v2047_v14 = vmul.f32 %v4019_v10, %v4010_v6 }
 0x28f   : > { %v2675_v5 = vpop.f32.mrb[20].mxu0  ;;  %v2301_v24 = vmul.f32 %v4024_v26, %v2239_v21 }
 0x290   : > { %v2034_v53 = vmul.f32 %v2675_v5, %v4019_v10  ;;  %v1947_v62 = vpop.f32.mrb[21].mxu0  ;;  %v2325_v43 = vadd.f32 %v4041_v7, %v2302_v52 }
 0x291   : > { %v2033_v46 = vmul.f32 %v4019_v10, %v1947_v62  ;;  %v2324_v34 = vadd.f32 %v4041_v7, %v2301_v24  ;;  %v2713_v19 = vpop.f32.mrb[18].mxu1  ;;  %v2070_v62 = vadd.f32 %v4035_v42, %v2047_v14 }
 0x292   : > { %v2057_v58 = vadd.f32 %v4035_v42, %v2034_v53  ;;  %v2304_v37 = vmul.f32 %v2713_v19, %v4024_v26  ;;  %v2249_v50 = vpop.f32.mrb[19].mxu1  ;;  %v4058_v15 = vadd.f32 %v2325_v43, %v2063_v2  ;;  %v2071_v53 = vadd.f32 %v4035_v42, %v2048_v16 }
 0x293   : > { %v2056_v40 = vadd.f32 %v4035_v42, %v2033_v46  ;;  %v2303_v20 = vmul.f32 %v4024_v26, %v2249_v50  ;;  %v4062_v25 = vadd.f32 %v2324_v34, %v2062_v22  ;;  %v2297_v43 = vmul.f32 %v4024_v26, %v4014_v3 }
 0x294   : > { %v2335_v35 = vadd.f32 %v2319_v60, %v2057_v58  ;;  %v2327_v39 = vadd.f32 %v4041_v7, %v2304_v37  ;;  %v2298_v60 = vmul.f32 %v4012_v17, %v4024_v26  ;;  %v2300_v3 = vmul.f32 %v4026_v55, %v4024_v26 }
 0x295   : > { %v2334_v47 = vadd.f32 %v2318_v0, %v2056_v40  ;;  %v2326_v9 = vadd.f32 %v4041_v7, %v2303_v20  ;;  %v2716_v12 = vpop.f32.mrb[20].mxu1  ;;  %v2320_v50 = vadd.f32 %v4041_v7, %v2297_v43 }
 0x296   : > { %v2306_v30 = vmul.f32 %v2716_v12, %v4024_v26  ;;  %v2259_v28 = vpop.f32.mrb[21].mxu1  ;;  %v4071_v29 = vadd.f32 %v2327_v39, %v2065_v32  ;;  %v2321_v19 = vadd.f32 %v4041_v7, %v2298_v60  ;;  %v2323_v39 = vadd.f32 %v4041_v7, %v2300_v3 }
 0x297   : > { %2350 = vxpose.xlu0.b32.start [1/16] (narrow) %v2334_v47, 8  ;;  %v2305_v23 = vmul.f32 %v4024_v26, %v2259_v28  ;;  %v2342_v63 = vadd.f32 %v2326_v9, %v2064_v41  ;;  %v2322_v47 = vadd.f32 %v4041_v7, %v2299_v4 }
 0x298   : > { %v2329_v38 = vadd.f32 %v4041_v7, %v2306_v30 }
 0x299   : > { %v2328_v8 = vadd.f32 %v4041_v7, %v2305_v23  ;;  %v2719_v31 = vpop.f32.mrb[22].mxu1 }
 0x29a   : > { %v2308_v13 = vmul.f32 %v2719_v31, %v4024_v26  ;;  %v2269_v48 = vpop.f32.mrb[23].mxu1  ;;  %v2345_v36 = vadd.f32 %v2329_v38, %v2067_v56 }
 0x29b   : > { %2351 = vxpose.xlu0.b32.cont [2/16] (narrow) %v2335_v35, 8  ;;  %v2307_v45 = vmul.f32 %v4024_v26, %v2269_v48  ;;  %v2344_v51 = vadd.f32 %v2328_v8, %v2066_v44 }
 0x29c   : > { %v2331_v11 = vadd.f32 %v4041_v7, %v2308_v13 }
 0x29d   : > { %v2330_v52 = vadd.f32 %v4041_v7, %v2307_v45  ;;  %v2722_v21 = vpop.f32.mrb[24].mxu1 }
 0x29e   : > { %v2310_v2 = vmul.f32 %v2722_v21, %v4024_v26  ;;  %v2279_v22 = vpop.f32.mrb[25].mxu1  ;;  %v2347_v5 = vadd.f32 %v2331_v11, %v2069_v54 }
 0x29f   : > { %v2309_v24 = vmul.f32 %v4024_v26, %v2279_v22  ;;  %v2346_v57 = vadd.f32 %v2330_v52, %v2068_v33 }
 0x2a0   : > { %v2333_v61 = vadd.f32 %v4041_v7, %v2310_v2 }
 0x2a1   : > { %v2332_v6 = vadd.f32 %v4041_v7, %v2309_v24 }
 0x2a2   : > { %v2349_v49 = vadd.f32 %v2333_v61, %v2071_v53 }
 0x2a3   : > { %v2348_v46 = vadd.f32 %v2332_v6, %v2070_v62  ;;  %v2678_v0 = vpop.f32.mrb[22].mxu0 }
 0x2a4   : > { %v2036_v34 = vmul.f32 %v2678_v0, %v4019_v10  ;;  %v1957_v58 = vpop.f32.mrb[23].mxu0 }
 0x2a5   : > { %v2035_v37 = vmul.f32 %v4019_v10, %v1957_v58 }
 0x2a6   : > { %v2059_v40 = vadd.f32 %v4035_v42, %v2036_v34 }
 0x2a7   : > { %v2058_v17 = vadd.f32 %v4035_v42, %v2035_v37 }
 0x2a8   : > { %v2337_v20 = vadd.f32 %v2321_v19, %v2059_v40 }
 0x2a9   : > { %v2336_v32 = vadd.f32 %v2320_v50, %v2058_v17 }
 0x2ab   : > { %2352 = vxpose.xlu0.b32.cont [3/16] (narrow) %v2336_v32, 8 }
 0x2af   : > { %2353 = vxpose.xlu0.b32.cont [4/16] (narrow) %v2337_v20, 8 }
 0x2b6   : > { %v2681_v35 = vpop.f32.mrb[24].mxu0 }
 0x2b7   : > { %v2038_v41 = vmul.f32 %v2681_v35, %v4019_v10  ;;  %v1967_v27 = vpop.f32.mrb[25].mxu0 }
 0x2b8   : > { %v2037_v9 = vmul.f32 %v4019_v10, %v1967_v27 }
 0x2b9   : > { %v2061_v12 = vadd.f32 %v4035_v42, %v2038_v41 }
 0x2ba   : > { %v2060_v30 = vadd.f32 %v4035_v42, %v2037_v9 }
 0x2bb   : > { %v2339_v55 = vadd.f32 %v2323_v39, %v2061_v12 }
 0x2bc   : > { %v2338_v28 = vadd.f32 %v2322_v47, %v2060_v30 }
 0x2be   : > { %2354 = vxpose.xlu0.b32.cont [5/16] (narrow) %v2338_v28, 8 }
 0x2c2   : > { %2355 = vxpose.xlu0.b32.cont [6/16] (narrow) %v2339_v55, 8 }
 0x2c6   : > { %2356 = vxpose.xlu0.b32.cont [7/16] (narrow) %v4062_v25, 8 }
 0x2ca   : > { %2357 = vxpose.xlu0.b32.cont [8/16] (narrow) %v4058_v15, 8 }
 0x2ce   : > { %2358 = vxpose.xlu0.b32.cont [9/16] (narrow) %v2342_v63, 8 }
 0x2d2   : > { %2359 = vxpose.xlu0.b32.cont [10/16] (narrow) %v4071_v29, 8 }
 0x2d6   : > { %2360 = vxpose.xlu0.b32.cont [11/16] (narrow) %v2344_v51, 8 }
 0x2da   : > { %2361 = vxpose.xlu0.b32.cont [12/16] (narrow) %v2345_v36, 8 }
 0x2de   : > { %2362 = vxpose.xlu0.b32.cont [13/16] (narrow) %v2346_v57, 8 }
 0x2e2   : > { %2363 = vxpose.xlu0.b32.cont [14/16] (narrow) %v2347_v5, 8 }
 0x2e6   : > { %2364 = vxpose.xlu0.b32.cont [15/16] (narrow) %v2348_v46, 8 }
 0x2ea   : > { %2365 = vxpose.xlu0.b32.end [16/16] (narrow) %v2349_v49, 8 }
 0x32e   : > { %v2366_v10 = vpop.trf.xlu0 }
 0x32f   : > { %2382 = vst [vmem:[%s447_s19] sm:$0xff] %v2366_v10 }
 0x330   : > { %2830 = shalt.err (!%p2827_p9)
}
 0x331   : > { %s2831_s17 = scalar_lea.hbm %s4126_s24, 128  ;;  %s2835_s13 = scalar_lea.hbm %s4216_s23, 512 }
 0x332   : > { %p2832_p10 = scmp.ne.s32.totalorder %s4126_s24, %s2831_s17  ;;  %p2836_p13 = scmp.lt.u32.totalorder %s4126_s24, %s4216_s23 }
 0x333   : > { %p2837_p0 = scmp.lt.u32.totalorder %s2835_s13, %s2831_s17  ;;  %p2839_p2 = scmp.lt.u32.totalorder %s2831_s17, %s4126_s24 }
 0x334   : > { %p2833_p11 = pnand %p2832_p10, %p3038_p3 }
 0x335   : > { %p2838_p1 = por %p2837_p0, %p2836_p13 }
 0x336   : > { %p2834_p12 = pneg %p2833_p11 }
 0x337   : > { %p2840_p4 = por %p2839_p2, %p2838_p1 }
 0x339   : > { %p2841_p5 = pnand %p2840_p4, %p2834_p12 }
 0x33b   : > { %2844 = shalt.err (!%p2841_p5)
}
 0x33c   : > { %2726 = dma.vmem_to_hbm [thread:$0]  (%p3038_p3), %s4128_s25, 128, %s4126_s24, %s2384_s0  }
 0x33d PF: > { %s4217_s29 = sld [smem:[#allocation6_spill]]  ;;  %p2732_p6 = scmp.ge.s32.totalorder %s2911_s15, 2 }
 0x33f   : > { %p2729_p7 = pnand %p2732_p6, %p3047_p8 }
 0x343   : > { %s2411_s28 = sand.u32 1, %s4217_s29  }
 0x344   : > { %s2412_s18 = scalar_lea.sflag [#allocation4], %s2411_s28 }
 0x345   : > { %2878 = dma.done.wait (!%p2729_p7), %s2412_s18, 128  }
 0x346   : > { %2880 = vsyncadd (!%p2729_p7), %s2412_s18, 4294967168  ;;  %s26_s15 = sadd.s32 1, %s2911_s15   ;;  %s4218_s21 = sld [smem:[#allocation11_spill]] }
 0x347   : > { %p23_p9 = scmp.ge.s32.totalorder %s26_s15, 6   ;;  %s4219_s28 = sld [smem:[#allocation7_spill]] }
 0x348   : > { %s4220_s29 = sld [smem:[#allocation8_spill]]  ;;  %s4221_s30 = sld [smem:[#allocation9_spill]] }
 0x349   : > { %s4222_s14 = sld [smem:[#allocation10_spill]]  ;;  %s4223_s25 = smov %s2887_s26 }
 0x34a   : > { %s4224_s26 = smov %s2891_s27  ;;  %25 = sbr.rel (!%p23_p9) target bundleno = 8 (0x8), region = 118 }
 0x34c   : > { %s4225_s27 = smov %s4218_s21 }
 0x351   :  { %2417 = vsyncpa [#allocation4], 1 }
 0x352   :  { %2419 = vsyncpa [#allocation4 + $0x1], 1 }

</bundles_post_ra>
